<compile_context>
chip_gen: v7x
topology: tpu7x:2x2x1
jax: 0.10.0
libtpu: 0.0.40
codegen_flags: <defaults>
</compile_context>

<pallas_src>
import functools

import jax
import jax.numpy as jnp
from jax.experimental import pallas as pl
from jax.experimental.pallas import tpu as pltpu

EPS = 1e-5  # nn.BatchNorm2d default eps


def _softplus(x):
    # matches torch.nn.Softplus(beta=1, threshold=20) used inside nn.Mish
    return jnp.where(x > 20.0, x, jnp.log1p(jnp.exp(jnp.minimum(x, 20.0))))


def _mish(x):
    return x * jnp.tanh(_softplus(x))


def _bn_scale_shift(s1, s2, gamma, beta, count):
    """Fold batch statistics into per-channel (scale, shift)."""
    # TODO(synk): for very large N*H*W use shifted/Welford sums; the single-pass
    # E[y^2]-mean^2 form can cancel catastrophically.
    mean = s1 / count
    var = s2 / count - mean * mean
    scale = gamma * jax.lax.rsqrt(var + EPS)
    return scale, beta - mean * scale


def gated_residual_block(x_nchw, params, kernel_size=3, strides=1,
                         tile_positions=None):
    """NCHW in, NCHW out, training-mode BatchNorm (batch statistics)."""
    assert strides == 1  # TODO(synk): strides>1 would stride the tap offsets.
    ks = int(kernel_size)
    pad = ks // 2
    N, Cin, H, W = x_nchw.shape
    Cout = params["w1"].shape[0]
    Hp, Wp = H + 2 * pad, W + 2 * pad
    n_core = N * Hp * Wp                  # padded flattened positions
    count = float(N * H * W)              # valid positions (BN population)
    f32 = jnp.float32
    bf16 = jnp.bfloat16

    # ---- tile sizes --------------------------------------------------------
    halo = max((ks - 1) * (Wp + 1), 1)    # largest tap offset
    HB = 128 * pl.cdiv(halo, 128)         # lane-aligned halo block
    if tile_positions is None:
        tile_positions = 32768            # large tiles: amortize per-step cost
    MT = HB * max(1, int(tile_positions) // HB)   # body block, multiple of HB
    G = pl.cdiv(n_core, MT)
    GM = G * MT

    # ---- wrapper-side layout plumbing (O(input) XLA ops, no im2col) --------
    xc = jnp.transpose(x_nchw, (1, 0, 2, 3)).astype(f32)           # (Cin,N,H,W)
    xp = jnp.pad(xc, ((0, 0), (0, 0), (pad, pad), (pad, pad)))     # (Cin,N,Hp,Wp)
    xflat = jnp.pad(xp.reshape(Cin, n_core),
                    ((0, 0), (0, GM + HB - n_core)))               # (Cin, GM+HB)

    m2d = jnp.zeros((Hp, Wp), f32).at[:H, :W].set(1.0)
    mask = jnp.pad(jnp.tile(m2d.reshape(-1), N),
                   (0, GM - n_core)).reshape(1, GM)                # (1, GM)

    # torch conv weights (Cout, Cin, KH, KW) -> per-tap (Cout, Cin)
    w1taps = jnp.stack([params["w1"][:, :, ky, kx]
                        for ky in range(ks) for kx in range(ks)],
                       axis=0).astype(f32)                          # (ks*ks,Cout,Cin)
    offs = [ky * Wp + kx for ky in range(ks) for kx in range(ks)]
    ctr = pad * Wp + pad                  # 1x1 shortcut reads the centre tap
    w2m = params["w2"][:, :, 0, 0].astype(f32)                      # (Cout, Cout)
    w3m = params["w3"][:, :, 0, 0].astype(f32)
    wsm = params["ws"][:, :, 0, 0].astype(f32)                      # (Cout, Cin)
    bias1s = jnp.stack([params["b1"], params["bs"]], axis=1).astype(f32)  # (Cout,2)

    # ---- common specs ------------------------------------------------------
    def mspec(c):                         # big (c, GM) arrays tiled over M
        return pl.BlockSpec((c, MT), lambda g: (0, g))

    def cspec(shape):                     # small resident params / weights
        return pl.BlockSpec(shape, lambda g: (0,) * len(shape))

    def sspec(k):                         # per-tile partial BN statistics
        return pl.BlockSpec((1, Cout, k), lambda g: (g, 0, 0))

    halo_spec = pl.BlockSpec((Cin, HB), lambda g: (0, (g + 1) * (MT // HB)))
    cparams = pltpu.CompilerParams(dimension_semantics=("parallel",))

    # ========== pass 1: conv1 -> y1 (bf16) + bn1 / bn_s statistics ==========
    def pass1_kernel(xb_ref, xh_ref, m_ref, w1_ref, ws_ref, b_ref,
                     y1_ref, st_ref, xs_ref):
        # stage body + halo contiguously in VMEM so the taps are plain offsets
        xs_ref[:, :MT] = xb_ref[...]
        xs_ref[:, MT:] = xh_ref[...]
        # single accumulator chain (MRB-accumulate friendly on v7x)
        y1 = jnp.dot(w1_ref[0], xs_ref[:, pl.ds(offs[0], MT)],
                     preferred_element_type=f32)
        for k in range(1, ks * ks):
            y1 = y1 + jnp.dot(w1_ref[k], xs_ref[:, pl.ds(offs[k], MT)],
                              preferred_element_type=f32)
        y1 = y1 + b_ref[:, 0:1]
        # shortcut conv output (statistics only; value recomputed in pass 3)
        s = jnp.dot(ws_ref[...], xs_ref[:, pl.ds(ctr, MT)],
                    preferred_element_type=f32) + b_ref[:, 1:2]
        y1_ref[...] = y1.astype(y1_ref.dtype)
        m = m_ref[...]
        y1m = y1 * m
        sm = s * m
        st_ref[0] = jnp.concatenate(
            [jnp.sum(y1m, axis=1, keepdims=True),
             jnp.sum(y1m * y1, axis=1, keepdims=True),
             jnp.sum(sm, axis=1, keepdims=True),
             jnp.sum(sm * s, axis=1, keepdims=True)], axis=1)

    y1_raw, st1 = pl.pallas_call(
        pass1_kernel,
        grid=(G,),
        in_specs=[mspec(Cin), halo_spec, mspec(1),
                  cspec(w1taps.shape), cspec(wsm.shape), cspec(bias1s.shape)],
        out_specs=[mspec(Cout), sspec(4)],
        out_shape=[jax.ShapeDtypeStruct((Cout, GM), bf16),
                   jax.ShapeDtypeStruct((G, Cout, 4), f32)],
        scratch_shapes=[pltpu.VMEM((Cin, MT + HB), f32)],
        compiler_params=cparams,
    )(xflat, xflat, mask, w1taps, wsm, bias1s)

    t1 = jnp.sum(st1, axis=0)
    sc1, sh1 = _bn_scale_shift(t1[:, 0], t1[:, 1], params["g1"].astype(f32),
                               params["be1"].astype(f32), count)
    scs, shs = _bn_scale_shift(t1[:, 2], t1[:, 3], params["gs"].astype(f32),
                               params["bes"].astype(f32), count)

    # ====== pass 2: bn1 -> mish -> conv2 -> y2 (bf16) + y2 moment matrix =====
    p2 = jnp.stack([sc1, sh1, params["b2"].astype(f32)], axis=1)    # (Cout, 3)

    def pass2_kernel(y1_ref, m_ref, w2_ref, p_ref, y2_ref, st_ref):
        a1 = _mish(y1_ref[...] * p_ref[:, 0:1] + p_ref[:, 1:2])
        y2 = jnp.dot(w2_ref[...], a1, preferred_element_type=f32) + p_ref[:, 2:3]
        y2_ref[...] = y2.astype(y2_ref.dtype)
        m = m_ref[...]
        y2m = y2 * m
        s1 = jnp.sum(y2m, axis=1, keepdims=True)                    # (Cout, 1)
        # masked second moment  M2[i, j] = sum_valid y2_i * y2_j  (8x8)
        cols = [jnp.sum(y2m * y2[j:j + 1, :], axis=1, keepdims=True)
                for j in range(Cout)]
        st_ref[0] = jnp.concatenate([s1] + cols, axis=1)            # (Cout,1+Cout)

    y2_raw, st2 = pl.pallas_call(
        pass2_kernel,
        grid=(G,),
        in_specs=[mspec(Cout), mspec(1), cspec(w2m.shape), cspec(p2.shape)],
        out_specs=[mspec(Cout), sspec(Cout + 1)],
        out_shape=[jax.ShapeDtypeStruct((Cout, GM), bf16),
                   jax.ShapeDtypeStruct((G, Cout, Cout + 1), f32)],
        compiler_params=cparams,
    )(y1_raw, mask, w2m, p2)

    # ---- bn2 stats + analytic bn3 stats (conv3∘bn2 is affine in y2) --------
    t2 = jnp.sum(st2, axis=0)                                       # (Cout, 1+Cout)
    s1_y2 = t2[:, 0]
    m2_y2 = t2[:, 1:]
    mean2 = s1_y2 / count
    cov2 = m2_y2 / count - jnp.outer(mean2, mean2)
    var2 = jnp.diag(cov2)
    g2 = params["g2"].astype(f32)
    sc2 = g2 * jax.lax.rsqrt(var2 + EPS)
    sh2 = params["be2"].astype(f32) - mean2 * sc2

    b3 = params["b3"].astype(f32)
    A = w3m * sc2[None, :]                       # y3 = A @ y2 + c
    c3 = w3m @ sh2 + b3
    mean3 = A @ mean2 + c3
    var3 = jnp.diag(A @ cov2 @ A.T)
    g3 = params["g3"].astype(f32)
    sc3 = g3 * jax.lax.rsqrt(var3 + EPS)
    sh3 = params["be3"].astype(f32) - mean3 * sc3

    # ======== pass 3: bn2 -> gate(conv3,bn3,sigmoid), shortcut, mish =========
    bs = params["bs"].astype(f32)
    p3 = jnp.stack([sc2, sh2,
                    sc3, sc3 * b3 + sh3,          # z = sc3*(W3@y2n) + this
                    scs, scs * bs + shs],         # res = scs*(Ws@x_c) + this
                   axis=1)                                          # (Cout, 6)

    def pass3_kernel(y2_ref, xb_ref, xh_ref, w3_ref, ws_ref, p_ref,
                     out_ref, xs_ref):
        y2n = y2_ref[...] * p_ref[:, 0:1] + p_ref[:, 1:2]
        z = (jnp.dot(w3_ref[...], y2n, preferred_element_type=f32)
             * p_ref[:, 2:3] + p_ref[:, 3:4])
        gate = pl.reciprocal(1.0 + jnp.exp(-z), approx=True)        # sigmoid (EUP)
        # recompute shortcut from x centre tap instead of re-reading s_raw
        xs_ref[:, :MT] = xb_ref[...]
        xs_ref[:, MT:] = xh_ref[...]
        s = jnp.dot(ws_ref[...], xs_ref[:, pl.ds(ctr, MT)],
                    preferred_element_type=f32)
        res = s * p_ref[:, 4:5] + p_ref[:, 5:6]
        out_ref[...] = _mish(y2n * gate + res).astype(out_ref.dtype)

    out_flat = pl.pallas_call(
        pass3_kernel,
        grid=(G,),
        in_specs=[mspec(Cout), mspec(Cin), halo_spec,
                  cspec(w3m.shape), cspec(wsm.shape), cspec(p3.shape)],
        out_specs=mspec(Cout),
        out_shape=jax.ShapeDtypeStruct((Cout, GM), f32),
        scratch_shapes=[pltpu.VMEM((Cin, MT + HB), f32)],
        compiler_params=cparams,
    )(y2_raw, xflat, xflat, w3m, wsm, p3)

    # ---- crop the padded flattened domain back to NCHW ----------------------
    out = out_flat[:, :n_core].reshape(Cout, N, Hp, Wp)[:, :, :H, :W]
    return jnp.transpose(out, (1, 0, 2, 3))


def reference_forward(x_nchw, params, kernel_size=3, strides=1):
    """Pure-JAX reference (lax.conv based, HIGHEST precision)."""
    hi = jax.lax.Precision.HIGHEST
    pad = kernel_size // 2
    x = jnp.transpose(x_nchw, (0, 2, 3, 1)).astype(jnp.float32)

    def bn(y, bias, gamma, beta):
        y = y + bias
        m = jnp.mean(y, axis=(0, 1, 2), keepdims=True)
        v = jnp.mean((y - m) ** 2, axis=(0, 1, 2), keepdims=True)
        return (y - m) / jnp.sqrt(v + EPS) * gamma + beta

    def conv(inp, w, stride, padding):
        w_hwio = jnp.transpose(w, (2, 3, 1, 0))
        return jax.lax.conv_general_dilated(
            inp, w_hwio, window_strides=(stride, stride), padding=padding,
            dimension_numbers=("NHWC", "HWIO", "NHWC"), precision=hi)

    p = params
    res = bn(conv(x, p["ws"], strides, [(0, 0), (0, 0)]), p["bs"], p["gs"], p["bes"])
    y1 = _mish(bn(conv(x, p["w1"], strides, [(pad, pad), (pad, pad)]),
                  p["b1"], p["g1"], p["be1"]))
    y2 = bn(conv(y1, p["w2"], 1, [(0, 0), (0, 0)]), p["b2"], p["g2"], p["be2"])
    gate = jax.nn.sigmoid(bn(conv(y2, p["w3"], 1, [(0, 0), (0, 0)]),
                             p["b3"], p["g3"], p["be3"]))
    out = _mish(y2 * gate + res)
    return jnp.transpose(out, (0, 3, 1, 2))


if __name__ == "__main__":
    N, Cin, Cout, H, W, ks, strides = 2, 4, 8, 16, 16, 3, 1
    key = jax.random.PRNGKey(0)
    keys = jax.random.split(key, 20)

    def nrm(k, shape, scale=0.1):
        return scale * jax.random.normal(k, shape, dtype=jnp.float32)

    params = {
        "w1": nrm(keys[0], (Cout, Cin, ks, ks)),
        "b1": nrm(keys[1], (Cout,)),
        "g1": 1.0 + nrm(keys[2], (Cout,)),
        "be1": nrm(keys[3], (Cout,)),
        "w2": nrm(keys[4], (Cout, Cout, 1, 1)),
        "b2": nrm(keys[5], (Cout,)),
        "g2": 1.0 + nrm(keys[6], (Cout,)),
        "be2": nrm(keys[7], (Cout,)),
        "w3": nrm(keys[8], (Cout, Cout, 1, 1)),
        "b3": nrm(keys[9], (Cout,)),
        "g3": 1.0 + nrm(keys[10], (Cout,)),
        "be3": nrm(keys[11], (Cout,)),
        "ws": nrm(keys[12], (Cout, Cin, 1, 1)),
        "bs": nrm(keys[13], (Cout,)),
        "gs": 1.0 + nrm(keys[14], (Cout,)),
        "bes": nrm(keys[15], (Cout,)),
    }
    x = jax.random.normal(keys[16], (N, Cin, H, W), dtype=jnp.float32)

    # small tile (256 positions) so the test exercises multi-tile BN statistics
    fwd = jax.jit(functools.partial(gated_residual_block, kernel_size=ks,
                                    strides=strides, tile_positions=256))
    out = jax.block_until_ready(fwd(x, params))
    ref = jax.block_until_ready(reference_forward(x, params, ks, strides))

    assert out.shape == (N, Cout, H, W)
    # Kernel uses single-pass bf16 MXU precision and bf16 intermediates;
    # reference uses HIGHEST f32 convolutions, so the bound is looser than a
    # pure-f32 comparison would allow.
    max_diff = float(jnp.max(jnp.abs(out - ref)))
    assert max_diff < 1e-1, f"kernel mismatch vs reference, max abs diff = {max_diff}"
    print("KERNEL_OK")
</pallas_src>

<mosaic_0001>
module attributes {stable_mosaic.version = 11 : i64} {
  func.func @pass1_kernel(%arg0: i32, %arg1: memref<4x256xf32, #tpu.memory_space<vmem>>, %arg2: memref<4x128xf32, #tpu.memory_space<vmem>>, %arg3: memref<1x256xf32, #tpu.memory_space<vmem>>, %arg4: memref<9x8x4xf32, #tpu.memory_space<vmem>>, %arg5: memref<8x4xf32, #tpu.memory_space<vmem>>, %arg6: memref<8x2xf32, #tpu.memory_space<vmem>>, %arg7: memref<8x256xbf16, #tpu.memory_space<vmem>>, %arg8: memref<1x8x4xf32, #tpu.memory_space<vmem>>, %arg9: memref<4x384xf32, #tpu.memory_space<vmem>>) attributes {dimension_semantics = [#tpu.dimension_semantics<parallel>], iteration_bounds = array<i64: 3>, scalar_prefetch = 0 : i64, scratch_operands = 1 : i64, tpu.core_type = #tpu.core_type<tc>, window_params = [{transform_indices = @transform_0, window_bounds = array<i64: 4, 256>}, {transform_indices = @transform_1, window_bounds = array<i64: 4, 128>}, {transform_indices = @transform_2, window_bounds = array<i64: 1, 256>}, {pipeline_mode = #tpu.pipeline_mode<synchronous>, transform_indices = @transform_3, window_bounds = array<i64: 9, 8, 4>}, {pipeline_mode = #tpu.pipeline_mode<synchronous>, transform_indices = @transform_4, window_bounds = array<i64: 8, 4>}, {pipeline_mode = #tpu.pipeline_mode<synchronous>, transform_indices = @transform_5, window_bounds = array<i64: 8, 2>}, {transform_indices = @transform_6, window_bounds = array<i64: 8, 256>}, {transform_indices = @transform_7, window_bounds = array<i64: 1, 8, 4>}]} {
    %c0 = arith.constant 0 : index
    %c0_0 = arith.constant 0 : index
    %0 = vector.load %arg1[%c0, %c0_0] : memref<4x256xf32, #tpu.memory_space<vmem>>, vector<4x256xf32>
    %c0_1 = arith.constant 0 : index
    %c0_2 = arith.constant 0 : index
    %1 = vector.load %arg9[%c0_1, %c0_2] : memref<4x384xf32, #tpu.memory_space<vmem>>, vector<4x256xf32>
    tpu.vector_store %arg9[%c0_1, %c0_2], %0 {strides = array<i32>} : memref<4x384xf32, #tpu.memory_space<vmem>>, vector<4x256xf32>,
    %c0_3 = arith.constant 0 : index
    %c0_4 = arith.constant 0 : index
    %2 = vector.load %arg2[%c0_3, %c0_4] : memref<4x128xf32, #tpu.memory_space<vmem>>, vector<4x128xf32>
    %c0_5 = arith.constant 0 : index
    %c256 = arith.constant 256 : index
    %3 = vector.load %arg9[%c0_5, %c256] : memref<4x384xf32, #tpu.memory_space<vmem>>, vector<4x128xf32>
    tpu.vector_store %arg9[%c0_5, %c256], %2 {strides = array<i32>} : memref<4x384xf32, #tpu.memory_space<vmem>>, vector<4x128xf32>,
    %c0_6 = arith.constant 0 : index
    %c0_7 = arith.constant 0 : index
    %c0_8 = arith.constant 0 : index
    %4 = vector.load %arg4[%c0_6, %c0_7, %c0_8] : memref<9x8x4xf32, #tpu.memory_space<vmem>>, vector<1x8x4xf32>
    %5 = vector.shape_cast %4 : vector<1x8x4xf32> to vector<8x4xf32>
    %c0_9 = arith.constant 0 : index
    %c0_10 = arith.constant 0 : index
    %6 = vector.load %arg9[%c0_9, %c0_10] : memref<4x384xf32, #tpu.memory_space<vmem>>, vector<4x256xf32>
    %cst = arith.constant dense<0.000000e+00> : vector<8x256xf32>
    %7 = tpu.matmul %5, %6, %cst {dimension_numbers = #tpu.dot_dimension_numbers<[1], [0], [0], [1], [0, 0, 1, 1], [], []>} : vector<8x4xf32>, vector<4x256xf32>, vector<8x256xf32> -> vector<8x256xf32>
    %c1 = arith.constant 1 : index
    %c0_11 = arith.constant 0 : index
    %c0_12 = arith.constant 0 : index
    %8 = vector.load %arg4[%c1, %c0_11, %c0_12] : memref<9x8x4xf32, #tpu.memory_space<vmem>>, vector<1x8x4xf32>
    %9 = vector.shape_cast %8 : vector<1x8x4xf32> to vector<8x4xf32>
    %c0_13 = arith.constant 0 : index
    %c1_14 = arith.constant 1 : index
    %10 = vector.load %arg9[%c0_13, %c1_14] : memref<4x384xf32, #tpu.memory_space<vmem>>, vector<4x256xf32>
    %cst_15 = arith.constant dense<0.000000e+00> : vector<8x256xf32>
    %11 = tpu.matmul %9, %10, %cst_15 {dimension_numbers = #tpu.dot_dimension_numbers<[1], [0], [0], [1], [0, 0, 1, 1], [], []>} : vector<8x4xf32>, vector<4x256xf32>, vector<8x256xf32> -> vector<8x256xf32>
    %12 = arith.addf %7, %11 : vector<8x256xf32>
    %c2 = arith.constant 2 : index
    %c0_16 = arith.constant 0 : index
    %c0_17 = arith.constant 0 : index
    %13 = vector.load %arg4[%c2, %c0_16, %c0_17] : memref<9x8x4xf32, #tpu.memory_space<vmem>>, vector<1x8x4xf32>
    %14 = vector.shape_cast %13 : vector<1x8x4xf32> to vector<8x4xf32>
    %c0_18 = arith.constant 0 : index
    %c2_19 = arith.constant 2 : index
    %15 = vector.load %arg9[%c0_18, %c2_19] : memref<4x384xf32, #tpu.memory_space<vmem>>, vector<4x256xf32>
    %cst_20 = arith.constant dense<0.000000e+00> : vector<8x256xf32>
    %16 = tpu.matmul %14, %15, %cst_20 {dimension_numbers = #tpu.dot_dimension_numbers<[1], [0], [0], [1], [0, 0, 1, 1], [], []>} : vector<8x4xf32>, vector<4x256xf32>, vector<8x256xf32> -> vector<8x256xf32>
    %17 = arith.addf %12, %16 : vector<8x256xf32>
    %c3 = arith.constant 3 : index
    %c0_21 = arith.constant 0 : index
    %c0_22 = arith.constant 0 : index
    %18 = vector.load %arg4[%c3, %c0_21, %c0_22] : memref<9x8x4xf32, #tpu.memory_space<vmem>>, vector<1x8x4xf32>
    %19 = vector.shape_cast %18 : vector<1x8x4xf32> to vector<8x4xf32>
    %c0_23 = arith.constant 0 : index
    %c18 = arith.constant 18 : index
    %20 = vector.load %arg9[%c0_23, %c18] : memref<4x384xf32, #tpu.memory_space<vmem>>, vector<4x256xf32>
    %cst_24 = arith.constant dense<0.000000e+00> : vector<8x256xf32>
    %21 = tpu.matmul %19, %20, %cst_24 {dimension_numbers = #tpu.dot_dimension_numbers<[1], [0], [0], [1], [0, 0, 1, 1], [], []>} : vector<8x4xf32>, vector<4x256xf32>, vector<8x256xf32> -> vector<8x256xf32>
    %22 = arith.addf %17, %21 : vector<8x256xf32>
    %c4 = arith.constant 4 : index
    %c0_25 = arith.constant 0 : index
    %c0_26 = arith.constant 0 : index
    %23 = vector.load %arg4[%c4, %c0_25, %c0_26] : memref<9x8x4xf32, #tpu.memory_space<vmem>>, vector<1x8x4xf32>
    %24 = vector.shape_cast %23 : vector<1x8x4xf32> to vector<8x4xf32>
    %c0_27 = arith.constant 0 : index
    %c19 = arith.constant 19 : index
    %25 = vector.load %arg9[%c0_27, %c19] : memref<4x384xf32, #tpu.memory_space<vmem>>, vector<4x256xf32>
    %cst_28 = arith.constant dense<0.000000e+00> : vector<8x256xf32>
    %26 = tpu.matmul %24, %25, %cst_28 {dimension_numbers = #tpu.dot_dimension_numbers<[1], [0], [0], [1], [0, 0, 1, 1], [], []>} : vector<8x4xf32>, vector<4x256xf32>, vector<8x256xf32> -> vector<8x256xf32>
    %27 = arith.addf %22, %26 : vector<8x256xf32>
    %c5 = arith.constant 5 : index
    %c0_29 = arith.constant 0 : index
    %c0_30 = arith.constant 0 : index
    %28 = vector.load %arg4[%c5, %c0_29, %c0_30] : memref<9x8x4xf32, #tpu.memory_space<vmem>>, vector<1x8x4xf32>
    %29 = vector.shape_cast %28 : vector<1x8x4xf32> to vector<8x4xf32>
    %c0_31 = arith.constant 0 : index
    %c20 = arith.constant 20 : index
    %30 = vector.load %arg9[%c0_31, %c20] : memref<4x384xf32, #tpu.memory_space<vmem>>, vector<4x256xf32>
    %cst_32 = arith.constant dense<0.000000e+00> : vector<8x256xf32>
    %31 = tpu.matmul %29, %30, %cst_32 {dimension_numbers = #tpu.dot_dimension_numbers<[1], [0], [0], [1], [0, 0, 1, 1], [], []>} : vector<8x4xf32>, vector<4x256xf32>, vector<8x256xf32> -> vector<8x256xf32>
    %32 = arith.addf %27, %31 : vector<8x256xf32>
    %c6 = arith.constant 6 : index
    %c0_33 = arith.constant 0 : index
    %c0_34 = arith.constant 0 : index
    %33 = vector.load %arg4[%c6, %c0_33, %c0_34] : memref<9x8x4xf32, #tpu.memory_space<vmem>>, vector<1x8x4xf32>
    %34 = vector.shape_cast %33 : vector<1x8x4xf32> to vector<8x4xf32>
    %c0_35 = arith.constant 0 : index
    %c36 = arith.constant 36 : index
    %35 = vector.load %arg9[%c0_35, %c36] : memref<4x384xf32, #tpu.memory_space<vmem>>, vector<4x256xf32>
    %cst_36 = arith.constant dense<0.000000e+00> : vector<8x256xf32>
    %36 = tpu.matmul %34, %35, %cst_36 {dimension_numbers = #tpu.dot_dimension_numbers<[1], [0], [0], [1], [0, 0, 1, 1], [], []>} : vector<8x4xf32>, vector<4x256xf32>, vector<8x256xf32> -> vector<8x256xf32>
    %37 = arith.addf %32, %36 : vector<8x256xf32>
    %c7 = arith.constant 7 : index
    %c0_37 = arith.constant 0 : index
    %c0_38 = arith.constant 0 : index
    %38 = vector.load %arg4[%c7, %c0_37, %c0_38] : memref<9x8x4xf32, #tpu.memory_space<vmem>>, vector<1x8x4xf32>
    %39 = vector.shape_cast %38 : vector<1x8x4xf32> to vector<8x4xf32>
    %c0_39 = arith.constant 0 : index
    %c37 = arith.constant 37 : index
    %40 = vector.load %arg9[%c0_39, %c37] : memref<4x384xf32, #tpu.memory_space<vmem>>, vector<4x256xf32>
    %cst_40 = arith.constant dense<0.000000e+00> : vector<8x256xf32>
    %41 = tpu.matmul %39, %40, %cst_40 {dimension_numbers = #tpu.dot_dimension_numbers<[1], [0], [0], [1], [0, 0, 1, 1], [], []>} : vector<8x4xf32>, vector<4x256xf32>, vector<8x256xf32> -> vector<8x256xf32>
    %42 = arith.addf %37, %41 : vector<8x256xf32>
    %c8 = arith.constant 8 : index
    %c0_41 = arith.constant 0 : index
    %c0_42 = arith.constant 0 : index
    %43 = vector.load %arg4[%c8, %c0_41, %c0_42] : memref<9x8x4xf32, #tpu.memory_space<vmem>>, vector<1x8x4xf32>
    %44 = vector.shape_cast %43 : vector<1x8x4xf32> to vector<8x4xf32>
    %c0_43 = arith.constant 0 : index
    %c38 = arith.constant 38 : index
    %45 = vector.load %arg9[%c0_43, %c38] : memref<4x384xf32, #tpu.memory_space<vmem>>, vector<4x256xf32>
    %cst_44 = arith.constant dense<0.000000e+00> : vector<8x256xf32>
    %46 = tpu.matmul %44, %45, %cst_44 {dimension_numbers = #tpu.dot_dimension_numbers<[1], [0], [0], [1], [0, 0, 1, 1], [], []>} : vector<8x4xf32>, vector<4x256xf32>, vector<8x256xf32> -> vector<8x256xf32>
    %47 = arith.addf %42, %46 : vector<8x256xf32>
    %c0_45 = arith.constant 0 : index
    %c0_46 = arith.constant 0 : index
    %48 = vector.load %arg6[%c0_45, %c0_46] : memref<8x2xf32, #tpu.memory_space<vmem>>, vector<8x1xf32>
    %49 = vector.broadcast %48 : vector<8x1xf32> to vector<8x256xf32>
    %50 = arith.addf %47, %49 : vector<8x256xf32>
    %c0_47 = arith.constant 0 : index
    %c0_48 = arith.constant 0 : index
    %51 = vector.load %arg5[%c0_47, %c0_48] : memref<8x4xf32, #tpu.memory_space<vmem>>, vector<8x4xf32>
    %c0_49 = arith.constant 0 : index
    %c19_50 = arith.constant 19 : index
    %52 = vector.load %arg9[%c0_49, %c19_50] : memref<4x384xf32, #tpu.memory_space<vmem>>, vector<4x256xf32>
    %cst_51 = arith.constant dense<0.000000e+00> : vector<8x256xf32>
    %53 = tpu.matmul %51, %52, %cst_51 {dimension_numbers = #tpu.dot_dimension_numbers<[1], [0], [0], [1], [0, 0, 1, 1], [], []>} : vector<8x4xf32>, vector<4x256xf32>, vector<8x256xf32> -> vector<8x256xf32>
    %c0_52 = arith.constant 0 : index
    %c1_53 = arith.constant 1 : index
    %54 = vector.load %arg6[%c0_52, %c1_53] : memref<8x2xf32, #tpu.memory_space<vmem>>, vector<8x1xf32>
    %55 = vector.broadcast %54 : vector<8x1xf32> to vector<8x256xf32>
    %56 = arith.addf %53, %55 : vector<8x256xf32>
    %57 = arith.truncf %50 : vector<8x256xf32> to vector<8x256xbf16>
    %c0_54 = arith.constant 0 : index
    %c0_55 = arith.constant 0 : index
    %58 = vector.load %arg7[%c0_54, %c0_55] : memref<8x256xbf16, #tpu.memory_space<vmem>>, vector<8x256xbf16>
    tpu.vector_store %arg7[%c0_54, %c0_55], %57 {strides = array<i32>} : memref<8x256xbf16, #tpu.memory_space<vmem>>, vector<8x256xbf16>,
    %c0_56 = arith.constant 0 : index
    %c0_57 = arith.constant 0 : index
    %59 = vector.load %arg3[%c0_56, %c0_57] : memref<1x256xf32, #tpu.memory_space<vmem>>, vector<1x256xf32>
    %60 = vector.broadcast %59 : vector<1x256xf32> to vector<8x256xf32>
    %61 = arith.mulf %50, %60 : vector<8x256xf32>
    %62 = vector.broadcast %59 : vector<1x256xf32> to vector<8x256xf32>
    %63 = arith.mulf %56, %62 : vector<8x256xf32>
    %cst_58 = arith.constant dense<0.000000e+00> : vector<8xf32>
    %64 = vector.multi_reduction <add>, %61, %cst_58 [1] : vector<8x256xf32> to vector<8xf32>
    %65 = vector.shape_cast %64 : vector<8xf32> to vector<8x1xf32>
    %66 = arith.mulf %61, %50 : vector<8x256xf32>
    %cst_59 = arith.constant dense<0.000000e+00> : vector<8xf32>
    %67 = vector.multi_reduction <add>, %66, %cst_59 [1] : vector<8x256xf32> to vector<8xf32>
    %68 = vector.shape_cast %67 : vector<8xf32> to vector<8x1xf32>
    %cst_60 = arith.constant dense<0.000000e+00> : vector<8xf32>
    %69 = vector.multi_reduction <add>, %63, %cst_60 [1] : vector<8x256xf32> to vector<8xf32>
    %70 = vector.shape_cast %69 : vector<8xf32> to vector<8x1xf32>
    %71 = arith.mulf %63, %56 : vector<8x256xf32>
    %cst_61 = arith.constant dense<0.000000e+00> : vector<8xf32>
    %72 = vector.multi_reduction <add>, %71, %cst_61 [1] : vector<8x256xf32> to vector<8xf32>
    %73 = vector.shape_cast %72 : vector<8xf32> to vector<8x1xf32>
    %74 = tpu.concatenate %65, %68, %70, %73 in 1 : vector<8x1xf32>, vector<8x1xf32>, vector<8x1xf32>, vector<8x1xf32> -> vector<8x4xf32>
    %c0_62 = arith.constant 0 : index
    %c0_63 = arith.constant 0 : index
    %c0_64 = arith.constant 0 : index
    %75 = vector.load %arg8[%c0_62, %c0_63, %c0_64] : memref<1x8x4xf32, #tpu.memory_space<vmem>>, vector<1x8x4xf32>
    %76 = vector.shape_cast %75 : vector<1x8x4xf32> to vector<8x4xf32>
    %77 = vector.shape_cast %74 : vector<8x4xf32> to vector<1x8x4xf32>
    tpu.vector_store %arg8[%c0_62, %c0_63, %c0_64], %77 {strides = array<i32>} : memref<1x8x4xf32, #tpu.memory_space<vmem>>, vector<1x8x4xf32>,
    return
  }
  func.func @transform_0(%arg0: i32) -> (i32, i32) {
    %c0_i32 = arith.constant 0 : i32
    %c0_i32_0 = arith.constant 0 : i32
    return %c0_i32, %arg0 : i32, i32
  }
  func.func @transform_1(%arg0: i32) -> (i32, i32) {
    %c1_i32 = arith.constant 1 : i32
    %0 = arith.addi %arg0, %c1_i32 : i32
    %c2_i32 = arith.constant 2 : i32
    %1 = arith.muli %0, %c2_i32 : i32
    %c0_i32 = arith.constant 0 : i32
    %c0_i32_0 = arith.constant 0 : i32
    return %c0_i32, %1 : i32, i32
  }
  func.func @transform_2(%arg0: i32) -> (i32, i32) {
    %c0_i32 = arith.constant 0 : i32
    %c0_i32_0 = arith.constant 0 : i32
    return %c0_i32, %arg0 : i32, i32
  }
  func.func @transform_3(%arg0: i32) -> (i32, i32, i32) {
    %c0_i32 = arith.constant 0 : i32
    %c0_i32_0 = arith.constant 0 : i32
    %c0_i32_1 = arith.constant 0 : i32
    %c0_i32_2 = arith.constant 0 : i32
    return %c0_i32, %c0_i32_0, %c0_i32_1 : i32, i32, i32
  }
  func.func @transform_4(%arg0: i32) -> (i32, i32) {
    %c0_i32 = arith.constant 0 : i32
    %c0_i32_0 = arith.constant 0 : i32
    %c0_i32_1 = arith.constant 0 : i32
    return %c0_i32, %c0_i32_0 : i32, i32
  }
  func.func @transform_5(%arg0: i32) -> (i32, i32) {
    %c0_i32 = arith.constant 0 : i32
    %c0_i32_0 = arith.constant 0 : i32
    %c0_i32_1 = arith.constant 0 : i32
    return %c0_i32, %c0_i32_0 : i32, i32
  }
  func.func @transform_6(%arg0: i32) -> (i32, i32) {
    %c0_i32 = arith.constant 0 : i32
    %c0_i32_0 = arith.constant 0 : i32
    return %c0_i32, %arg0 : i32, i32
  }
  func.func @transform_7(%arg0: i32) -> (i32, i32, i32) {
    %c0_i32 = arith.constant 0 : i32
    %c0_i32_0 = arith.constant 0 : i32
    %c0_i32_1 = arith.constant 0 : i32
    return %arg0, %c0_i32, %c0_i32_0 : i32, i32, i32
  }
}

module attributes {stable_mosaic.version = 11 : i64} {
  func.func @pass2_kernel(%arg0: i32, %arg1: memref<8x256xbf16, #tpu.memory_space<vmem>>, %arg2: memref<1x256xf32, #tpu.memory_space<vmem>>, %arg3: memref<8x8xf32, #tpu.memory_space<vmem>>, %arg4: memref<8x3xf32, #tpu.memory_space<vmem>>, %arg5: memref<8x256xbf16, #tpu.memory_space<vmem>>, %arg6: memref<1x8x9xf32, #tpu.memory_space<vmem>>) attributes {dimension_semantics = [#tpu.dimension_semantics<parallel>], iteration_bounds = array<i64: 3>, scalar_prefetch = 0 : i64, scratch_operands = 0 : i64, tpu.core_type = #tpu.core_type<tc>, window_params = [{transform_indices = @transform_0, window_bounds = array<i64: 8, 256>}, {transform_indices = @transform_1, window_bounds = array<i64: 1, 256>}, {pipeline_mode = #tpu.pipeline_mode<synchronous>, transform_indices = @transform_2, window_bounds = array<i64: 8, 8>}, {pipeline_mode = #tpu.pipeline_mode<synchronous>, transform_indices = @transform_3, window_bounds = array<i64: 8, 3>}, {transform_indices = @transform_4, window_bounds = array<i64: 8, 256>}, {transform_indices = @transform_5, window_bounds = array<i64: 1, 8, 9>}]} {
    %c0 = arith.constant 0 : index
    %c0_0 = arith.constant 0 : index
    %0 = vector.load %arg1[%c0, %c0_0] : memref<8x256xbf16, #tpu.memory_space<vmem>>, vector<8x256xbf16>
    %c0_1 = arith.constant 0 : index
    %c0_2 = arith.constant 0 : index
    %1 = vector.load %arg4[%c0_1, %c0_2] : memref<8x3xf32, #tpu.memory_space<vmem>>, vector<8x1xf32>
    %2 = arith.extf %0 : vector<8x256xbf16> to vector<8x256xf32>
    %3 = vector.broadcast %1 : vector<8x1xf32> to vector<8x256xf32>
    %4 = arith.mulf %2, %3 : vector<8x256xf32>
    %c0_3 = arith.constant 0 : index
    %c1 = arith.constant 1 : index
    %5 = vector.load %arg4[%c0_3, %c1] : memref<8x3xf32, #tpu.memory_space<vmem>>, vector<8x1xf32>
    %6 = vector.broadcast %5 : vector<8x1xf32> to vector<8x256xf32>
    %7 = arith.addf %4, %6 : vector<8x256xf32>
    %cst = arith.constant 2.000000e+01 : f32
    %8 = vector.broadcast %cst : f32 to vector<8x256xf32>
    %9 = arith.cmpf ogt, %7, %8 : vector<8x256xf32>
    %cst_4 = arith.constant 2.000000e+01 : f32
    %10 = vector.broadcast %cst_4 : f32 to vector<8x256xf32>
    %11 = arith.minimumf %7, %10 : vector<8x256xf32>
    %12 = math.exp %11 : vector<8x256xf32>
    %13 = math.log1p %12 : vector<8x256xf32>
    %14 = arith.select %9, %7, %13 : vector<8x256xi1>, vector<8x256xf32>
    %15 = math.tanh %14 : vector<8x256xf32>
    %16 = arith.mulf %7, %15 : vector<8x256xf32>
    %c0_5 = arith.constant 0 : index
    %c0_6 = arith.constant 0 : index
    %17 = vector.load %arg3[%c0_5, %c0_6] : memref<8x8xf32, #tpu.memory_space<vmem>>, vector<8x8xf32>
    %cst_7 = arith.constant dense<0.000000e+00> : vector<8x256xf32>
    %18 = tpu.matmul %17, %16, %cst_7 {dimension_numbers = #tpu.dot_dimension_numbers<[1], [0], [0], [1], [0, 0, 1, 1], [], []>} : vector<8x8xf32>, vector<8x256xf32>, vector<8x256xf32> -> vector<8x256xf32>
    %c0_8 = arith.constant 0 : index
    %c2 = arith.constant 2 : index
    %19 = vector.load %arg4[%c0_8, %c2] : memref<8x3xf32, #tpu.memory_space<vmem>>, vector<8x1xf32>
    %20 = vector.broadcast %19 : vector<8x1xf32> to vector<8x256xf32>
    %21 = arith.addf %18, %20 : vector<8x256xf32>
    %22 = arith.truncf %21 : vector<8x256xf32> to vector<8x256xbf16>
    %c0_9 = arith.constant 0 : index
    %c0_10 = arith.constant 0 : index
    %23 = vector.load %arg5[%c0_9, %c0_10] : memref<8x256xbf16, #tpu.memory_space<vmem>>, vector<8x256xbf16>
    tpu.vector_store %arg5[%c0_9, %c0_10], %22 {strides = array<i32>} : memref<8x256xbf16, #tpu.memory_space<vmem>>, vector<8x256xbf16>,
    %c0_11 = arith.constant 0 : index
    %c0_12 = arith.constant 0 : index
    %24 = vector.load %arg2[%c0_11, %c0_12] : memref<1x256xf32, #tpu.memory_space<vmem>>, vector<1x256xf32>
    %25 = vector.broadcast %24 : vector<1x256xf32> to vector<8x256xf32>
    %26 = arith.mulf %21, %25 : vector<8x256xf32>
    %cst_13 = arith.constant dense<0.000000e+00> : vector<8xf32>
    %27 = vector.multi_reduction <add>, %26, %cst_13 [1] : vector<8x256xf32> to vector<8xf32>
    %28 = vector.shape_cast %27 : vector<8xf32> to vector<8x1xf32>
    %29 = vector.extract_strided_slice %21 {offsets = [0, 0], sizes = [1, 256], strides = [1, 1]} : vector<8x256xf32> to vector<1x256xf32>
    %30 = vector.broadcast %29 : vector<1x256xf32> to vector<8x256xf32>
    %31 = arith.mulf %26, %30 : vector<8x256xf32>
    %cst_14 = arith.constant dense<0.000000e+00> : vector<8xf32>
    %32 = vector.multi_reduction <add>, %31, %cst_14 [1] : vector<8x256xf32> to vector<8xf32>
    %33 = vector.shape_cast %32 : vector<8xf32> to vector<8x1xf32>
    %34 = vector.extract_strided_slice %21 {offsets = [1, 0], sizes = [1, 256], strides = [1, 1]} : vector<8x256xf32> to vector<1x256xf32>
    %35 = vector.broadcast %34 : vector<1x256xf32> to vector<8x256xf32>
    %36 = arith.mulf %26, %35 : vector<8x256xf32>
    %cst_15 = arith.constant dense<0.000000e+00> : vector<8xf32>
    %37 = vector.multi_reduction <add>, %36, %cst_15 [1] : vector<8x256xf32> to vector<8xf32>
    %38 = vector.shape_cast %37 : vector<8xf32> to vector<8x1xf32>
    %39 = vector.extract_strided_slice %21 {offsets = [2, 0], sizes = [1, 256], strides = [1, 1]} : vector<8x256xf32> to vector<1x256xf32>
    %40 = vector.broadcast %39 : vector<1x256xf32> to vector<8x256xf32>
    %41 = arith.mulf %26, %40 : vector<8x256xf32>
    %cst_16 = arith.constant dense<0.000000e+00> : vector<8xf32>
    %42 = vector.multi_reduction <add>, %41, %cst_16 [1] : vector<8x256xf32> to vector<8xf32>
    %43 = vector.shape_cast %42 : vector<8xf32> to vector<8x1xf32>
    %44 = vector.extract_strided_slice %21 {offsets = [3, 0], sizes = [1, 256], strides = [1, 1]} : vector<8x256xf32> to vector<1x256xf32>
    %45 = vector.broadcast %44 : vector<1x256xf32> to vector<8x256xf32>
    %46 = arith.mulf %26, %45 : vector<8x256xf32>
    %cst_17 = arith.constant dense<0.000000e+00> : vector<8xf32>
    %47 = vector.multi_reduction <add>, %46, %cst_17 [1] : vector<8x256xf32> to vector<8xf32>
    %48 = vector.shape_cast %47 : vector<8xf32> to vector<8x1xf32>
    %49 = vector.extract_strided_slice %21 {offsets = [4, 0], sizes = [1, 256], strides = [1, 1]} : vector<8x256xf32> to vector<1x256xf32>
    %50 = vector.broadcast %49 : vector<1x256xf32> to vector<8x256xf32>
    %51 = arith.mulf %26, %50 : vector<8x256xf32>
    %cst_18 = arith.constant dense<0.000000e+00> : vector<8xf32>
    %52 = vector.multi_reduction <add>, %51, %cst_18 [1] : vector<8x256xf32> to vector<8xf32>
    %53 = vector.shape_cast %52 : vector<8xf32> to vector<8x1xf32>
    %54 = vector.extract_strided_slice %21 {offsets = [5, 0], sizes = [1, 256], strides = [1, 1]} : vector<8x256xf32> to vector<1x256xf32>
    %55 = vector.broadcast %54 : vector<1x256xf32> to vector<8x256xf32>
    %56 = arith.mulf %26, %55 : vector<8x256xf32>
    %cst_19 = arith.constant dense<0.000000e+00> : vector<8xf32>
    %57 = vector.multi_reduction <add>, %56, %cst_19 [1] : vector<8x256xf32> to vector<8xf32>
    %58 = vector.shape_cast %57 : vector<8xf32> to vector<8x1xf32>
    %59 = vector.extract_strided_slice %21 {offsets = [6, 0], sizes = [1, 256], strides = [1, 1]} : vector<8x256xf32> to vector<1x256xf32>
    %60 = vector.broadcast %59 : vector<1x256xf32> to vector<8x256xf32>
    %61 = arith.mulf %26, %60 : vector<8x256xf32>
    %cst_20 = arith.constant dense<0.000000e+00> : vector<8xf32>
    %62 = vector.multi_reduction <add>, %61, %cst_20 [1] : vector<8x256xf32> to vector<8xf32>
    %63 = vector.shape_cast %62 : vector<8xf32> to vector<8x1xf32>
    %64 = vector.extract_strided_slice %21 {offsets = [7, 0], sizes = [1, 256], strides = [1, 1]} : vector<8x256xf32> to vector<1x256xf32>
    %65 = vector.broadcast %64 : vector<1x256xf32> to vector<8x256xf32>
    %66 = arith.mulf %26, %65 : vector<8x256xf32>
    %cst_21 = arith.constant dense<0.000000e+00> : vector<8xf32>
    %67 = vector.multi_reduction <add>, %66, %cst_21 [1] : vector<8x256xf32> to vector<8xf32>
    %68 = vector.shape_cast %67 : vector<8xf32> to vector<8x1xf32>
    %69 = tpu.concatenate %28, %33, %38, %43, %48, %53, %58, %63, %68 in 1 : vector<8x1xf32>, vector<8x1xf32>, vector<8x1xf32>, vector<8x1xf32>, vector<8x1xf32>, vector<8x1xf32>, vector<8x1xf32>, vector<8x1xf32>, vector<8x1xf32> -> vector<8x9xf32>
    %c0_22 = arith.constant 0 : index
    %c0_23 = arith.constant 0 : index
    %c0_24 = arith.constant 0 : index
    %70 = vector.load %arg6[%c0_22, %c0_23, %c0_24] : memref<1x8x9xf32, #tpu.memory_space<vmem>>, vector<1x8x9xf32>
    %71 = vector.shape_cast %70 : vector<1x8x9xf32> to vector<8x9xf32>
    %72 = vector.shape_cast %69 : vector<8x9xf32> to vector<1x8x9xf32>
    tpu.vector_store %arg6[%c0_22, %c0_23, %c0_24], %72 {strides = array<i32>} : memref<1x8x9xf32, #tpu.memory_space<vmem>>, vector<1x8x9xf32>,
    return
  }
  func.func @transform_0(%arg0: i32) -> (i32, i32) {
    %c0_i32 = arith.constant 0 : i32
    %c0_i32_0 = arith.constant 0 : i32
    return %c0_i32, %arg0 : i32, i32
  }
  func.func @transform_1(%arg0: i32) -> (i32, i32) {
    %c0_i32 = arith.constant 0 : i32
    %c0_i32_0 = arith.constant 0 : i32
    return %c0_i32, %arg0 : i32, i32
  }
  func.func @transform_2(%arg0: i32) -> (i32, i32) {
    %c0_i32 = arith.constant 0 : i32
    %c0_i32_0 = arith.constant 0 : i32
    %c0_i32_1 = arith.constant 0 : i32
    return %c0_i32, %c0_i32_0 : i32, i32
  }
  func.func @transform_3(%arg0: i32) -> (i32, i32) {
    %c0_i32 = arith.constant 0 : i32
    %c0_i32_0 = arith.constant 0 : i32
    %c0_i32_1 = arith.constant 0 : i32
    return %c0_i32, %c0_i32_0 : i32, i32
  }
  func.func @transform_4(%arg0: i32) -> (i32, i32) {
    %c0_i32 = arith.constant 0 : i32
    %c0_i32_0 = arith.constant 0 : i32
    return %c0_i32, %arg0 : i32, i32
  }
  func.func @transform_5(%arg0: i32) -> (i32, i32, i32) {
    %c0_i32 = arith.constant 0 : i32
    %c0_i32_0 = arith.constant 0 : i32
    %c0_i32_1 = arith.constant 0 : i32
    return %arg0, %c0_i32, %c0_i32_0 : i32, i32, i32
  }
}

module attributes {stable_mosaic.version = 11 : i64} {
  func.func @pass3_kernel(%arg0: i32, %arg1: memref<8x256xbf16, #tpu.memory_space<vmem>>, %arg2: memref<4x256xf32, #tpu.memory_space<vmem>>, %arg3: memref<4x128xf32, #tpu.memory_space<vmem>>, %arg4: memref<8x8xf32, #tpu.memory_space<vmem>>, %arg5: memref<8x4xf32, #tpu.memory_space<vmem>>, %arg6: memref<8x6xf32, #tpu.memory_space<vmem>>, %arg7: memref<8x256xf32, #tpu.memory_space<vmem>>, %arg8: memref<4x384xf32, #tpu.memory_space<vmem>>) attributes {dimension_semantics = [#tpu.dimension_semantics<parallel>], iteration_bounds = array<i64: 3>, scalar_prefetch = 0 : i64, scratch_operands = 1 : i64, tpu.core_type = #tpu.core_type<tc>, window_params = [{transform_indices = @transform_0, window_bounds = array<i64: 8, 256>}, {transform_indices = @transform_1, window_bounds = array<i64: 4, 256>}, {transform_indices = @transform_2, window_bounds = array<i64: 4, 128>}, {pipeline_mode = #tpu.pipeline_mode<synchronous>, transform_indices = @transform_3, window_bounds = array<i64: 8, 8>}, {pipeline_mode = #tpu.pipeline_mode<synchronous>, transform_indices = @transform_4, window_bounds = array<i64: 8, 4>}, {pipeline_mode = #tpu.pipeline_mode<synchronous>, transform_indices = @transform_5, window_bounds = array<i64: 8, 6>}, {transform_indices = @transform_6, window_bounds = array<i64: 8, 256>}]} {
    %c0 = arith.constant 0 : index
    %c0_0 = arith.constant 0 : index
    %0 = vector.load %arg1[%c0, %c0_0] : memref<8x256xbf16, #tpu.memory_space<vmem>>, vector<8x256xbf16>
    %c0_1 = arith.constant 0 : index
    %c0_2 = arith.constant 0 : index
    %1 = vector.load %arg6[%c0_1, %c0_2] : memref<8x6xf32, #tpu.memory_space<vmem>>, vector<8x1xf32>
    %2 = arith.extf %0 : vector<8x256xbf16> to vector<8x256xf32>
    %3 = vector.broadcast %1 : vector<8x1xf32> to vector<8x256xf32>
    %4 = arith.mulf %2, %3 : vector<8x256xf32>
    %c0_3 = arith.constant 0 : index
    %c1 = arith.constant 1 : index
    %5 = vector.load %arg6[%c0_3, %c1] : memref<8x6xf32, #tpu.memory_space<vmem>>, vector<8x1xf32>
    %6 = vector.broadcast %5 : vector<8x1xf32> to vector<8x256xf32>
    %7 = arith.addf %4, %6 : vector<8x256xf32>
    %c0_4 = arith.constant 0 : index
    %c0_5 = arith.constant 0 : index
    %8 = vector.load %arg4[%c0_4, %c0_5] : memref<8x8xf32, #tpu.memory_space<vmem>>, vector<8x8xf32>
    %cst = arith.constant dense<0.000000e+00> : vector<8x256xf32>
    %9 = tpu.matmul %8, %7, %cst {dimension_numbers = #tpu.dot_dimension_numbers<[1], [0], [0], [1], [0, 0, 1, 1], [], []>} : vector<8x8xf32>, vector<8x256xf32>, vector<8x256xf32> -> vector<8x256xf32>
    %c0_6 = arith.constant 0 : index
    %c2 = arith.constant 2 : index
    %10 = vector.load %arg6[%c0_6, %c2] : memref<8x6xf32, #tpu.memory_space<vmem>>, vector<8x1xf32>
    %11 = vector.broadcast %10 : vector<8x1xf32> to vector<8x256xf32>
    %12 = arith.mulf %9, %11 : vector<8x256xf32>
    %c0_7 = arith.constant 0 : index
    %c3 = arith.constant 3 : index
    %13 = vector.load %arg6[%c0_7, %c3] : memref<8x6xf32, #tpu.memory_space<vmem>>, vector<8x1xf32>
    %14 = vector.broadcast %13 : vector<8x1xf32> to vector<8x256xf32>
    %15 = arith.addf %12, %14 : vector<8x256xf32>
    %cst_8 = arith.constant 0.000000e+00 : f32
    %16 = vector.broadcast %cst_8 : f32 to vector<8x256xf32>
    %17 = arith.subf %16, %15 : vector<8x256xf32>
    %18 = math.exp %17 : vector<8x256xf32>
    %cst_9 = arith.constant 1.000000e+00 : f32
    %19 = vector.broadcast %cst_9 : f32 to vector<8x256xf32>
    %20 = arith.addf %19, %18 : vector<8x256xf32>
    %21 = tpu.reciprocal %20 {approx = true} : vector<8x256xf32> -> vector<8x256xf32>
    %c0_10 = arith.constant 0 : index
    %c0_11 = arith.constant 0 : index
    %22 = vector.load %arg2[%c0_10, %c0_11] : memref<4x256xf32, #tpu.memory_space<vmem>>, vector<4x256xf32>
    %c0_12 = arith.constant 0 : index
    %c0_13 = arith.constant 0 : index
    %23 = vector.load %arg8[%c0_12, %c0_13] : memref<4x384xf32, #tpu.memory_space<vmem>>, vector<4x256xf32>
    tpu.vector_store %arg8[%c0_12, %c0_13], %22 {strides = array<i32>} : memref<4x384xf32, #tpu.memory_space<vmem>>, vector<4x256xf32>,
    %c0_14 = arith.constant 0 : index
    %c0_15 = arith.constant 0 : index
    %24 = vector.load %arg3[%c0_14, %c0_15] : memref<4x128xf32, #tpu.memory_space<vmem>>, vector<4x128xf32>
    %c0_16 = arith.constant 0 : index
    %c256 = arith.constant 256 : index
    %25 = vector.load %arg8[%c0_16, %c256] : memref<4x384xf32, #tpu.memory_space<vmem>>, vector<4x128xf32>
    tpu.vector_store %arg8[%c0_16, %c256], %24 {strides = array<i32>} : memref<4x384xf32, #tpu.memory_space<vmem>>, vector<4x128xf32>,
    %c0_17 = arith.constant 0 : index
    %c0_18 = arith.constant 0 : index
    %26 = vector.load %arg5[%c0_17, %c0_18] : memref<8x4xf32, #tpu.memory_space<vmem>>, vector<8x4xf32>
    %c0_19 = arith.constant 0 : index
    %c19 = arith.constant 19 : index
    %27 = vector.load %arg8[%c0_19, %c19] : memref<4x384xf32, #tpu.memory_space<vmem>>, vector<4x256xf32>
    %cst_20 = arith.constant dense<0.000000e+00> : vector<8x256xf32>
    %28 = tpu.matmul %26, %27, %cst_20 {dimension_numbers = #tpu.dot_dimension_numbers<[1], [0], [0], [1], [0, 0, 1, 1], [], []>} : vector<8x4xf32>, vector<4x256xf32>, vector<8x256xf32> -> vector<8x256xf32>
    %c0_21 = arith.constant 0 : index
    %c4 = arith.constant 4 : index
    %29 = vector.load %arg6[%c0_21, %c4] : memref<8x6xf32, #tpu.memory_space<vmem>>, vector<8x1xf32>
    %30 = vector.broadcast %29 : vector<8x1xf32> to vector<8x256xf32>
    %31 = arith.mulf %28, %30 : vector<8x256xf32>
    %c0_22 = arith.constant 0 : index
    %c5 = arith.constant 5 : index
    %32 = vector.load %arg6[%c0_22, %c5] : memref<8x6xf32, #tpu.memory_space<vmem>>, vector<8x1xf32>
    %33 = vector.broadcast %32 : vector<8x1xf32> to vector<8x256xf32>
    %34 = arith.addf %31, %33 : vector<8x256xf32>
    %35 = arith.mulf %7, %21 : vector<8x256xf32>
    %36 = arith.addf %35, %34 : vector<8x256xf32>
    %cst_23 = arith.constant 2.000000e+01 : f32
    %37 = vector.broadcast %cst_23 : f32 to vector<8x256xf32>
    %38 = arith.cmpf ogt, %36, %37 : vector<8x256xf32>
    %cst_24 = arith.constant 2.000000e+01 : f32
    %39 = vector.broadcast %cst_24 : f32 to vector<8x256xf32>
    %40 = arith.minimumf %36, %39 : vector<8x256xf32>
    %41 = math.exp %40 : vector<8x256xf32>
    %42 = math.log1p %41 : vector<8x256xf32>
    %43 = arith.select %38, %36, %42 : vector<8x256xi1>, vector<8x256xf32>
    %44 = math.tanh %43 : vector<8x256xf32>
    %45 = arith.mulf %36, %44 : vector<8x256xf32>
    %c0_25 = arith.constant 0 : index
    %c0_26 = arith.constant 0 : index
    %46 = vector.load %arg7[%c0_25, %c0_26] : memref<8x256xf32, #tpu.memory_space<vmem>>, vector<8x256xf32>
    tpu.vector_store %arg7[%c0_25, %c0_26], %45 {strides = array<i32>} : memref<8x256xf32, #tpu.memory_space<vmem>>, vector<8x256xf32>,
    return
  }
  func.func @transform_0(%arg0: i32) -> (i32, i32) {
    %c0_i32 = arith.constant 0 : i32
    %c0_i32_0 = arith.constant 0 : i32
    return %c0_i32, %arg0 : i32, i32
  }
  func.func @transform_1(%arg0: i32) -> (i32, i32) {
    %c0_i32 = arith.constant 0 : i32
    %c0_i32_0 = arith.constant 0 : i32
    return %c0_i32, %arg0 : i32, i32
  }
  func.func @transform_2(%arg0: i32) -> (i32, i32) {
    %c1_i32 = arith.constant 1 : i32
    %0 = arith.addi %arg0, %c1_i32 : i32
    %c2_i32 = arith.constant 2 : i32
    %1 = arith.muli %0, %c2_i32 : i32
    %c0_i32 = arith.constant 0 : i32
    %c0_i32_0 = arith.constant 0 : i32
    return %c0_i32, %1 : i32, i32
  }
  func.func @transform_3(%arg0: i32) -> (i32, i32) {
    %c0_i32 = arith.constant 0 : i32
    %c0_i32_0 = arith.constant 0 : i32
    %c0_i32_1 = arith.constant 0 : i32
    return %c0_i32, %c0_i32_0 : i32, i32
  }
  func.func @transform_4(%arg0: i32) -> (i32, i32) {
    %c0_i32 = arith.constant 0 : i32
    %c0_i32_0 = arith.constant 0 : i32
    %c0_i32_1 = arith.constant 0 : i32
    return %c0_i32, %c0_i32_0 : i32, i32
  }
  func.func @transform_5(%arg0: i32) -> (i32, i32) {
    %c0_i32 = arith.constant 0 : i32
    %c0_i32_0 = arith.constant 0 : i32
    %c0_i32_1 = arith.constant 0 : i32
    return %c0_i32, %c0_i32_0 : i32, i32
  }
  func.func @transform_6(%arg0: i32) -> (i32, i32) {
    %c0_i32 = arith.constant 0 : i32
    %c0_i32_0 = arith.constant 0 : i32
    return %c0_i32, %arg0 : i32, i32
  }
}

</mosaic_0001>

<bundles_post_ra>
// kernel: tile.6
= control target key start
LH: loop header
LB: loop body
LE: loop exit
PB: predicated region body
PF: predicated region fallthrough
CT: control target
= control target key end

     0   :  { %s46_s0 = inlined_call_operand.vmem [shape: f32[324], index: 0, kind: input, shape index: {}]   ;;  %s47_s1 = inlined_call_operand.vmem [shape: f32[2,324], index: 1, kind: output, shape index: {}]  }
   0x1   :  { %v4_v0 = vld [vmem:[%s46_s0] ss:$0 sm:$0xff]  ;;  %v14_v1 = vld [vmem:[%s46_s0 + $0x1] ss:$0 sm:$0xff]  ;;  %v16_v2 = vld [vmem:[%s46_s0 + $0x2] ss:$0 sm:$0xff] }
   0x2   :  { %5 = vst [vmem:[%s47_s1] sm:$0x3] %v4_v0  ;;  %15 = vst [vmem:[%s47_s1 + $0x2] sm:$0x3] %v14_v1 }
   0x3   :  { %17 = vst [vmem:[%s47_s1 + $0x4] sm:$0x3] %v16_v2 }

// kernel: tile.5
= control target key start
LH: loop header
LB: loop body
LE: loop exit
PB: predicated region body
PF: predicated region fallthrough
CT: control target
= control target key end

     0   :  { %vm9_vm0 = vcmask 15360   ;;  %vm22_vm1 = vcmask 31744   ;;  %s173_s14 = smov 126   ;;  %s174_s15 = smov 108   ;;  %vm3_vm2 = vcmask 146432   ;;  %vm13_vm3 = vcmask 130048   ;;  %s263_s0 = inlined_call_operand.vmem [shape: f32[18,18], index: 0, kind: input, shape index: {}]   ;;  %s264_s1 = inlined_call_operand.vmem [shape: f32[324], index: 1, kind: output, shape index: {}]  }
   0x1   :  { %v137_v0 = vld [vmem:[%s263_s0 + $0x7] sm:$0x1]   ;;  %v141_v3 = vld [vmem:[%s263_s0 + $0x6] sm:$0x1]   ;;  %v139_v4 = vld [vmem:[%s263_s0 + $0xe] sm:$0x1]  }
   0x2   :  { %v138_v1 = vld [vmem:[%s263_s0 + $0x7] sm:$0x1]   ;;  %34 = vrot.lane.b32.xlu1 %v141_v3, %s174_s15  ;;  %v140_v5 = vld [vmem:[%s263_s0 + $0xe] sm:$0x1]   ;;  %v142_v7 = vld [vmem:[%s263_s0 + $0xd] sm:$0x1]  }
   0x3   :  { %v10_v2 = vsel %vm9_vm0, %v138_v1, %v137_v0  ;;  %v23_v6 = vsel %vm22_vm1, %v140_v5, %v139_v4  ;;  %s175_s20 = smov 124   ;;  %s176_s21 = smov 106   ;;  %v143_v8 = vld [vmem:[%s263_s0 + $0x5] sm:$0x1]   ;;  %v144_v9 = vld [vmem:[%s263_s0 + $0xc] sm:$0x1]  }
   0x4   :  { %11 = vrot.lane.b32.xlu0 %v10_v2, %s173_s14  ;;  %s177_s26 = smov 90   ;;  %s178_s27 = smov 88   ;;  %v2_v10 = vld [vmem:[%s263_s0] sm:$0x1]   ;;  %v145_v11 = vld [vmem:[%s263_s0 + $0x4] sm:$0x1]  }
   0x5   :  { %v146_v12 = vld [vmem:[%s263_s0 + $0xb] sm:$0x1]   ;;  %4 = vst.msk [vmem:[#allocation0] sm:$0x1] %vm3_vm2, %v2_v10   ;;  %s179_s5 = smov 72   ;;  %s180_s6 = smov 70  }
   0x6   :  { %40 = vrot.lane.b32.xlu1 %v142_v7, %s176_s21  ;;  %v147_v13 = vld [vmem:[%s263_s0 + $0x3] sm:$0x1]   ;;  %v148_v14 = vld [vmem:[%s263_s0 + $0xa] sm:$0x1]   ;;  %s181_s11 = smov 54   ;;  %s182_s12 = smov 52  }
   0x7   :  { %v149_v15 = vld [vmem:[%s263_s0 + $0x11] sm:$0x1]   ;;  %v150_v16 = vld [vmem:[%s263_s0 + $0x2] sm:$0x1]   ;;  %s183_s17 = smov 50   ;;  %s184_s18 = smov 36  }
   0x8   :  { %24 = vrot.lane.b32.xlu0 %v23_v6, %s175_s20  ;;  %v151_v17 = vld [vmem:[%s263_s0 + $0x9] sm:$0x1]   ;;  %v152_v18 = vld [vmem:[%s263_s0 + $0x10] sm:$0x1]   ;;  %s185_s23 = smov 34   ;;  %s186_s24 = smov 32  }
   0x9   :  { %v153_v19 = vld [vmem:[%s263_s0 + $0x1] sm:$0x1]   ;;  %v154_v20 = vld [vmem:[%s263_s0 + $0x8] sm:$0x1]   ;;  %s187_s29 = smov 18   ;;  %s188_s30 = smov 16  }
   0xa   :  { %53 = vrot.lane.b32.xlu1 %v144_v9, %s178_s27  ;;  %v155_v21 = vld [vmem:[%s263_s0 + $0xf] sm:$0x1]   ;;  %s189_s0 = smov 14   ;;  %vm16_vm4 = vcmask 1048560   ;;  %vm36_vm5 = vcmask 1032032   ;;  %vm26_vm6 = vcmask 113664  }
   0xb   :  { %vm29_vm7 = vcmask 1048544   ;;  %vm42_vm8 = vcmask 1015632   ;;  %vm49_vm9 = vcmask 884432   ;;  %vm55_vm10 = vcmask 868032  }
   0xc   :  { %47 = vrot.lane.b32.xlu0 %v143_v8, %s177_s26  ;;  %vm62_vm11 = vcmask 736832   ;;  %vm68_vm12 = vcmask 720432   ;;  %vm75_vm13 = vcmask 589232   ;;  %vm81_vm14 = vcmask 572832  }
   0xd   :  { %vm88_vm15 = vcmask 556432   ;;  %vm95_vm0 = vcmask 441632   ;;  %vm101_vm1 = vcmask 425232   ;;  %vm108_vm2 = vcmask 408832  }
   0xe   :  { %66 = vrot.lane.b32.xlu1 %v146_v12, %s180_s6 }
  0x10   :  { %60 = vrot.lane.b32.xlu0 %v145_v11, %s179_s5 }
  0x12   :  { %79 = vrot.lane.b32.xlu1 %v148_v14, %s182_s12 }
  0x14   :  { %73 = vrot.lane.b32.xlu0 %v147_v13, %s181_s11 }
  0x16   :  { %93 = vrot.lane.b32.xlu1 %v150_v16, %s184_s18 }
  0x18   :  { %86 = vrot.lane.b32.xlu0 %v149_v15, %s183_s17 }
  0x1a   :  { %106 = vrot.lane.b32.xlu1 %v152_v18, %s186_s24 }
  0x1c   :  { %99 = vrot.lane.b32.xlu0 %v151_v17, %s185_s23 }
  0x1e   :  { %119 = vrot.lane.b32.xlu1 %v154_v20, %s188_s30 }
  0x20   :  { %113 = vrot.lane.b32.xlu0 %v153_v19, %s187_s29 }
  0x24   :  { %126 = vrot.lane.b32.xlu0 %v155_v21, %s189_s0 }
  0x74   :  { %v35_v23 = vpop.permute.xlu1 %34  }
  0x76   :  { %v12_v22 = vpop.permute.xlu0 %11  }
  0x77   :  { %15 = vst.msk [vmem:[#allocation0 + $0x1] sm:$0x1] %vm13_vm3, %v12_v22   ;;  %vm115_vm3 = vcmask 294032  }
  0x78   :  { %17 = vst.msk [vmem:[#allocation0] sm:$0x1] %vm16_vm4, %v12_v22   ;;  %v41_v25 = vpop.permute.xlu1 %40   ;;  %vm121_vm4 = vcmask 277632  }
  0x79   :  { %37 = vst.msk [vmem:[#allocation0] sm:$0x1] %vm36_vm5, %v35_v23   ;;  %vm128_vm5 = vcmask 261232  }
  0x7a   :  { %v25_v24 = vpop.permute.xlu0 %24  }
  0x7b   :  { %28 = vst.msk [vmem:[#allocation0 + $0x2] sm:$0x1] %vm26_vm6, %v25_v24  }
  0x7c   :  { %31 = vst.msk [vmem:[#allocation0 + $0x1] sm:$0x1] %vm29_vm7, %v25_v24   ;;  %v54_v27 = vpop.permute.xlu1 %53  }
  0x7d   :  { %44 = vst.msk [vmem:[#allocation0 + $0x1] sm:$0x1] %vm42_vm8, %v41_v25  }
  0x7e   :  { %v48_v26 = vpop.permute.xlu0 %47   ;;  %57 = vst.msk [vmem:[#allocation0 + $0x1] sm:$0x1] %vm55_vm10, %v54_v27  }
  0x7f   :  { %50 = vst.msk [vmem:[#allocation0] sm:$0x1] %vm49_vm9, %v48_v26  }
  0x80   :  { %v67_v29 = vpop.permute.xlu1 %66  }
  0x81   :  { %70 = vst.msk [vmem:[#allocation0 + $0x1] sm:$0x1] %vm68_vm12, %v67_v29  }
  0x82   :  { %v61_v28 = vpop.permute.xlu0 %60  }
  0x83   :  { %63 = vst.msk [vmem:[#allocation0] sm:$0x1] %vm62_vm11, %v61_v28  }
  0x84   :  { %v80_v31 = vpop.permute.xlu1 %79  }
  0x85   :  { %83 = vst.msk [vmem:[#allocation0 + $0x1] sm:$0x1] %vm81_vm14, %v80_v31  }
  0x86   :  { %v74_v30 = vpop.permute.xlu0 %73  }
  0x87   :  { %76 = vst.msk [vmem:[#allocation0] sm:$0x1] %vm75_vm13, %v74_v30  }
  0x88   :  { %v94_v33 = vpop.permute.xlu1 %93  }
  0x89   :  { %96 = vst.msk [vmem:[#allocation0] sm:$0x1] %vm95_vm0, %v94_v33  }
  0x8a   :  { %v87_v32 = vpop.permute.xlu0 %86  }
  0x8b   :  { %90 = vst.msk [vmem:[#allocation0 + $0x2] sm:$0x1] %vm88_vm15, %v87_v32  }
  0x8c   :  { %v107_v35 = vpop.permute.xlu1 %106  }
  0x8d   :  { %110 = vst.msk [vmem:[#allocation0 + $0x2] sm:$0x1] %vm108_vm2, %v107_v35  }
  0x8e   :  { %v100_v34 = vpop.permute.xlu0 %99  }
  0x8f   :  { %103 = vst.msk [vmem:[#allocation0 + $0x1] sm:$0x1] %vm101_vm1, %v100_v34  }
  0x90   :  { %v120_v37 = vpop.permute.xlu1 %119  }
  0x91   :  { %123 = vst.msk [vmem:[#allocation0 + $0x1] sm:$0x1] %vm121_vm4, %v120_v37  }
  0x92   :  { %v114_v36 = vpop.permute.xlu0 %113  }
  0x93   :  { %116 = vst.msk [vmem:[#allocation0] sm:$0x1] %vm115_vm3, %v114_v36  }
  0x96   :  { %v127_v38 = vpop.permute.xlu0 %126  }
  0x97   :  { %130 = vst.msk [vmem:[#allocation0 + $0x2] sm:$0x1] %vm128_vm5, %v127_v38  }
  0x9e   :  { %v134_v39 = vld [vmem:[#allocation0] sm:$0xf] }
  0x9f   :  { %136 = vst [vmem:[%s264_s1] sm:$0xf] %v134_v39 }

// kernel: tile.7
= control target key start
LH: loop header
LB: loop body
LE: loop exit
PB: predicated region body
PF: predicated region fallthrough
CT: control target
= control target key end

     0   :  { %vm27_vm0 = vcmask 490496   ;;  %vm17_vm1 = vcmask 556032   ;;  %s38_s12 = smov 3  ;;  %s53_s13 = smov 68   ;;  %vm31_vm2 = vcmask 64512   ;;  %vm34_vm3 = vcmask 1048096   ;;  %s90_s0 = inlined_call_operand.vmem [shape: f32[2,324], index: 0, kind: input, shape index: {}]   ;;  %s91_s1 = inlined_call_operand.vmem [shape: f32[648], index: 1, kind: output, shape index: {}]  }
   0x1   :  { %v46_v0 = vld [vmem:[%s90_s0 + $0x4] sm:$0x3]  ;;  %v47_v1 = vld [vmem:[%s90_s0 + $0x2] sm:$0x3]  ;;  %v13_v2 = vld [vmem:[%s90_s0] sm:$0x3] }
   0x2   :  { %8 = vst [vmem:[#allocation0 + $0x10] sm:$0x3] %v46_v0  ;;  %12 = vst [vmem:[#allocation0 + $0x8] sm:$0x3] %v47_v1  ;;  %s20_s0 = smov 3 }
   0x3   :  { %14 = vst [vmem:[#allocation0] sm:$0x3] %v13_v2 }
   0x9   :  { %v24_v3 = vld [vmem:[#allocation0 + $0x11] sm:$0x1]   ;;  %v16_v7 = vld [vmem:[#allocation0 + $0x10] sm:$0x1]  }
   0xa   :  { %v26_v4 = vld [vmem:[#allocation0 + $0x1] ss:$8 sm:$0x7]   ;;  %v21_v6 = vld [vmem:[#allocation0] ss:$8 sm:%s20_s0]  }
   0xb   :  { %v28_v5 = vsel %vm27_vm0, %v26_v4, %v24_v3  ;;  %22 = vst [vmem:[%s91_s1] sm:$0x3] %v21_v6   ;;  %48 = vst.msk [vmem:[%s91_s1 + $0x2] sm:$0x1] %vm17_vm1, %v16_v7   ;;  %v39_v8 = vld [vmem:[#allocation0 + $0x1] ss:$8 sm:%s38_s12]  }
   0xc   :  { %29 = vrot.lane.b32.xlu0 %v28_v5, %s53_s13 }
  0x10   :  { %40 = vrot.lane.b32.xlu0 %v39_v8, %s53_s13 }
  0x7e   :  { %v30_v9 = vpop.permute.xlu0 %29  }
  0x7f   :  { %49 = vst.msk [vmem:[%s91_s1 + $0x5] sm:$0x1] %vm31_vm2, %v30_v9  }
  0x80   :  { %50 = vst.msk [vmem:[%s91_s1 + $0x2] sm:$0x7] %vm34_vm3, %v30_v9  }
  0x82   :  { %v41_v10 = vpop.permute.xlu0 %40  }
  0x83   :  { %51 = vst.msk [vmem:[%s91_s1 + $0x3] sm:$0x3] %vm17_vm1, %v41_v10  }

// kernel: gated_residual_block.4
= control target key start
LH: loop header
LB: loop body
LE: loop exit
PB: predicated region body
PF: predicated region fallthrough
CT: control target
= control target key end

     0   :  { %s716_s18 = smov 0   ;;  %s760_s0 = inlined_call_operand.vmem [shape: bf16[8,768], index: 0, kind: input, shape index: {}]   ;;  %s761_s1 = inlined_call_operand.vmem [shape: f32[1,768], index: 1, kind: input, shape index: {}]   ;;  %s762_s2 = inlined_call_operand.vmem [shape: f32[8,8], index: 2, kind: input, shape index: {}]   ;;  %s763_s3 = inlined_call_operand.vmem [shape: f32[8,3], index: 3, kind: input, shape index: {}]   ;;  %s764_s4 = inlined_call_operand.vmem [shape: bf16[8,768], index: 4, kind: output, shape index: {0}]   ;;  %s765_s5 = inlined_call_operand.vmem [shape: f32[3,8,9], index: 5, kind: output, shape index: {1}]  }
   0x1 LB: > { %s722_s19 = sadd.s32 4294967295, %s680_s18   ;;  %p634_p0 = scmp.ge.s32.totalorder %s680_s18, 1  ;;  %s680_s18 = sphi %s716_s18, %s16_s18  }
   0x2   : > { %p201_p1 = scmp.lt.s32.totalorder %s680_s18, 4 }
   0x4   : > { %p202_p2 = pnand %p634_p0, %p201_p1 }
   0x5   : > { %v259_v0 = vld [vmem:[%s763_s3] sm:$0xff] (!%p202_p2)  ;;  %v682_v1 = vmov (!%p202_p2), 0   ;;  %v683_v2 = vmov (!%p202_p2), 1   ;;  %v684_v3 = vmov (!%p202_p2), 0.0   ;;  %v685_v4 = vmov (!%p202_p2), 2   ;;  %s635_s22 = sshll.u32 (!%p202_p2), %s722_s19, 1 }
   0x6   : > { %205 = sbr.rel (%p202_p2) target bundleno = 569 (0x239), region = 36  ;;  %658 = vset.pattern.permute.xlu0 (!%p202_p2), %v682_v1  ;;  %380 = vmatprep.mubr.f32.mxu0 (!%p202_p2), %v684_v3  ;;  %p238_p3 = scmp.lt.s32.totalorder (!%p202_p2), %s635_s22, 5  ;;  %v307_v42 = vld [vmem:[%s762_s2] sm:$0xff] (!%p202_p2)  ;;  %vm312_vm4 = vcmask (!%p202_p2), 64512   ;;  %v398_v43 = vlaneseq (!%p202_p2)  ;;  %vm517_vm5 = vcmask (!%p202_p2), 7168   ;;  %vm519_vm6 = vcmask (!%p202_p2), 15360  }
   0x7   : > { %264 = vperm.xlu0 (!%p202_p2), %658, %v259_v0   ;;  %660 = vset.pattern.permute.xlu1 (!%p202_p2), %v685_v4  ;;  %vm521_vm7 = vcmask (!%p202_p2), 23552   ;;  %p254_p4 = scmp.lt.s32.totalorder (!%p202_p2), %s722_s19, 2  ;;  %vm523_vm8 = vcmask (!%p202_p2), 31744   ;;  %vm525_vm9 = vcmask (!%p202_p2), 39936   ;;  %vm527_vm10 = vcmask (!%p202_p2), 48128  }
   0x8   : > { %309 = vperm.xlu1 (!%p202_p2), %660, %v259_v0   ;;  %v399_v44 = vshrl.u32 (!%p202_p2), %v398_v43, 7  ;;  %vm529_vm11 = vcmask (!%p202_p2), 56320   ;;  %vm532_vm12 = vcmask (!%p202_p2), 72704  }
   0xa   : > { %v400_v45 = vsub.s32 (!%p202_p2), 0, %v399_v44  ;;  %v404_v46 = vsub.s32 (!%p202_p2), 1, %v399_v44  ;;  %v441_v50 = vsub.s32 (!%p202_p2), 2, %v399_v44  ;;  %v454_v55 = vsub.s32 (!%p202_p2), 3, %v399_v44 }
   0xb   : > { %659 = vset.pattern.permute.xlu0 (!%p202_p2), %v683_v2  ;;  %v467_v56 = vsub.s32 (!%p202_p2), 4, %v399_v44  ;;  %v480_v58 = vsub.s32 (!%p202_p2), 5, %v399_v44  ;;  %v493_v59 = vsub.s32 (!%p202_p2), 6, %v399_v44  ;;  %v506_v60 = vsub.s32 (!%p202_p2), 7, %v399_v44 }
   0xc   : > { %270 = vperm.xlu0 (!%p202_p2), %659, %v259_v0  }
   0xd   : > { %s767_s22 = smov (!%p238_p3, %s635_s22), 5  ;;  %s769_s19 = smov (!%p254_p4, %s722_s19), 2 }
   0xe   : > { %s636_s23 = sshll.u32 %s767_s22, 2  ;;  %s246_s6 = scalar_lea.vmem %s761_s1, %s767_s22 }
   0xf   : > { %s241_s26 = scalar_lea.vmem %s760_s0, %s636_s23  ;;  %v396_v47 = vld [vmem:[%s246_s6] sm:$0x3]  ;;  %s252_s9 = scalar_lea.vmem %s764_s4, %s636_s23 }
  0x10   : > { %661 = vset.pattern.permute.xlu0 %v685_v4  ;;  %v258_v5 = vld [vmem:[%s241_s26] sm:$0xff]  ;;  %v401_v49 = vrot.slane %v396_v47, %v400_v45  ;;  %v405_v51 = vrot.slane %v396_v47, %v404_v46  ;;  %s640_s10 = sshll.u32 %s769_s19, 3 }
  0x11   : > { %v260_v7 = vunpack.c.l.bf16 %v258_v5  ;;  %v261_v8 = vunpack.c.h.bf16 %v258_v5  ;;  %s257_s13 = scalar_lea.vmem %s765_s5, %s640_s10 }
  0x86   : > { %v265_v6 = vpop.permute.xlu0 %264 }
  0x87   : > { %v267_v9 = vmul.f32 %v265_v6, %v260_v7  ;;  %v268_v10 = vmul.f32 %v265_v6, %v261_v8  ;;  %v310_v48 = vpop.permute.xlu1 %309 }
  0x8b   : > { %v271_v11 = vpop.permute.xlu0 %270 }
  0x8c   : > { %v273_v12 = vadd.f32 %v271_v11, %v267_v9  ;;  %v274_v13 = vadd.f32 %v271_v11, %v268_v10 }
  0x8e   : > { %v277_v14 = vmin.f32 %v273_v12, 20.0  ;;  %v278_v15 = vmin.f32 %v274_v13, 20.0  ;;  %vm275_vm1 = vcmp.gt.f32.partialorder %v273_v12, 20.0  ;;  %vm276_vm3 = vcmp.gt.f32.partialorder %v274_v13, 20.0 }
  0x90   : > { %v279_v16 = vmul.f32 1.442695, %v277_v14  ;;  %v281_v17 = vmul.f32 1.442695, %v278_v15 }
  0x92   : > { %662 = vpow2.f32 %v279_v16 }
  0x93   : > { %664 = vpow2.f32 %v281_v17 }
  0x9c   : > { %v663_v18 = vpop.eup %662 }
  0x9d   : > { %v665_v19 = vpop.eup %664  ;;  %v283_v20 = vadd.f32 1.0, %v663_v18  ;;  %v286_v22 = vmul.f32 -0.5, %v663_v18  ;;  %v289_v25 = vand.u32 2147483647, %v663_v18 }
  0x9e   : > { %v292_v21 = vadd.f32 1.0, %v665_v19  ;;  %v295_v23 = vmul.f32 -0.5, %v665_v19  ;;  %v298_v27 = vand.u32 2147483647, %v665_v19 }
  0x9f   : > { %666 = vlog2.f32 %v283_v20  ;;  %v287_v24 = vadd.f32 1.0, %v286_v22  ;;  %vm290_vm0 = vcmp.lt.f32.partialorder %v289_v25, 0.0004427343 }
  0xa0   : > { %668 = vlog2.f32 %v292_v21  ;;  %v296_v26 = vadd.f32 1.0, %v295_v23  ;;  %vm299_vm2 = vcmp.lt.f32.partialorder %v298_v27, 0.0004427343 }
  0xa1   : > { %v288_v31 = vmul.f32 %v663_v18, %v287_v24 }
  0xa2   : > { %v297_v33 = vmul.f32 %v665_v19, %v296_v26 }
  0xa9   : > { %v667_v28 = vpop.eup %666 }
  0xaa   : > { %v669_v29 = vpop.eup %668  ;;  %v285_v30 = vmul.f32 0.6931472, %v667_v28 }
  0xab   : > { %v294_v32 = vmul.f32 0.6931472, %v669_v29 }
  0xac   : > { %v291_v34 = vsel %vm290_vm0, %v288_v31, %v285_v30 }
  0xad   : > { %v300_v35 = vsel %vm299_vm2, %v297_v33, %v294_v32  ;;  %v301_v36 = vsel %vm275_vm1, %v273_v12, %v291_v34 }
  0xae   : > { %v302_v37 = vsel %vm276_vm3, %v274_v13, %v300_v35  ;;  %670 = vtanh.f32 %v301_v36 }
  0xaf   : > { %672 = vtanh.f32 %v302_v37 }
  0xb8   : > { %v671_v38 = vpop.eup %670 }
  0xb9   : > { %v673_v39 = vpop.eup %672  ;;  %v305_v40 = vmul.f32 %v671_v38, %v273_v12 }
  0xba   : > { %v306_v41 = vmul.f32 %v673_v39, %v274_v13 }
  0xbc   : > { %316 = vmatprep.subr.mxu0 %v306_v41 }
  0xbd   : > { %317 = vmatpush1.msra.mxu0 %v305_v40 }
  0xbe   : > { %641 = vmatmul.mubr.msk.f32.vlgmr.msra.gmra.mrb[0].mxu0 %vm312_vm4, %v307_v42 }
 0x191   : > { %v382_v52 = vpop.f32.mrb[0].mxu0 }
 0x192   : > { %v383_v53 = vadd.f32 %v382_v52, %v310_v48  ;;  %v384_v54 = vpop.f32.mrb[1].mxu0 }
 0x193   : > { %v385_v57 = vadd.f32 %v384_v54, %v310_v48 }
 0x194   : > { %v408_v61 = vmul.f32 %v401_v49, %v383_v53  ;;  %v416_v62 = vrot.slane %v383_v53, %v400_v45  ;;  %v429_v63 = vrot.slane %v383_v53, %v404_v46  ;;  %v442_v0 = vrot.slane %v383_v53, %v441_v50 }
 0x195   : > { %v645_v1 = vpack.c.bf16 %v385_v57, %v383_v53  ;;  %v409_v2 = vmul.f32 %v405_v51, %v385_v57  ;;  %v420_v3 = vrot.slane %v385_v57, %v400_v45  ;;  %v433_v4 = vrot.slane %v385_v57, %v404_v46 }
 0x196   : > { %v421_v5 = vmul.f32 %v416_v62, %v408_v61  ;;  %v434_v6 = vmul.f32 %v429_v63, %v408_v61  ;;  %v446_v7 = vrot.slane %v385_v57, %v441_v50  ;;  %v447_v8 = vmul.f32 %v442_v0, %v408_v61 }
 0x197   : > { %395 = vst [vmem:[%s252_s9] sm:$0xff] %v645_v1  ;;  %v410_v9 = vadd.f32 %v409_v2, %v408_v61  ;;  %v422_v10 = vmul.f32 %v420_v3, %v409_v2  ;;  %v435_v11 = vmul.f32 %v433_v4, %v409_v2  ;;  %v455_v12 = vrot.slane %v383_v53, %v454_v55 }
 0x198   : > { %v448_v13 = vmul.f32 %v446_v7, %v409_v2  ;;  %v459_v14 = vrot.slane %v385_v57, %v454_v55  ;;  %v468_v15 = vrot.slane %v383_v53, %v467_v56  ;;  %v472_v16 = vrot.slane %v385_v57, %v467_v56 }
 0x199   : > { %411 = vadd.xlane.f32.xlu1 %v410_v9  ;;  %v423_v17 = vadd.f32 %v422_v10, %v421_v5  ;;  %v436_v18 = vadd.f32 %v435_v11, %v434_v6  ;;  %v460_v19 = vmul.f32 %v455_v12, %v408_v61  ;;  %v481_v20 = vrot.slane %v383_v53, %v480_v58 }
 0x19a   : > { %v449_v21 = vadd.f32 %v448_v13, %v447_v8  ;;  %v461_v22 = vmul.f32 %v459_v14, %v409_v2  ;;  %v473_v23 = vmul.f32 %v468_v15, %v408_v61  ;;  %v474_v24 = vmul.f32 %v472_v16, %v409_v2 }
 0x19b   : > { %424 = vadd.xlane.f32.xlu0 %v423_v17  ;;  %v485_v25 = vrot.slane %v385_v57, %v480_v58  ;;  %v486_v26 = vmul.f32 %v481_v20, %v408_v61  ;;  %v494_v27 = vrot.slane %v383_v53, %v493_v59  ;;  %v498_v28 = vrot.slane %v385_v57, %v493_v59 }
 0x19c   : > { %v462_v29 = vadd.f32 %v461_v22, %v460_v19  ;;  %v475_v30 = vadd.f32 %v474_v24, %v473_v23  ;;  %v507_v31 = vrot.slane %v383_v53, %v506_v60  ;;  %v511_v32 = vrot.slane %v385_v57, %v506_v60 }
 0x19d   : > { %437 = vadd.xlane.f32.xlu1 %v436_v18  ;;  %v487_v33 = vmul.f32 %v485_v25, %v409_v2  ;;  %v499_v34 = vmul.f32 %v494_v27, %v408_v61  ;;  %v500_v35 = vmul.f32 %v498_v28, %v409_v2 }
 0x19e   : > { %v512_v36 = vmul.f32 %v507_v31, %v408_v61  ;;  %v513_v37 = vmul.f32 %v511_v32, %v409_v2 }
 0x19f   : > { %450 = vadd.xlane.f32.xlu0 %v449_v21  ;;  %v488_v38 = vadd.f32 %v487_v33, %v486_v26  ;;  %v501_v39 = vadd.f32 %v500_v35, %v499_v34 }
 0x1a0   : > { %v514_v40 = vadd.f32 %v513_v37, %v512_v36 }
 0x1a1   : > { %463 = vadd.xlane.f32.xlu1 %v462_v29 }
 0x1a3   : > { %476 = vadd.xlane.f32.xlu0 %v475_v30 }
 0x1a5   : > { %489 = vadd.xlane.f32.xlu1 %v488_v38 }
 0x1a7   : > { %502 = vadd.xlane.f32.xlu0 %v501_v39 }
 0x1a9   : > { %515 = vadd.xlane.f32.xlu1 %v514_v40 }
 0x226   : > { %v412_v41 = vpop.xlane.xlu1 %411 }
 0x228   : > { %v425_v42 = vpop.xlane.xlu0 %424 }
 0x229   : > { %v518_v43 = vsel %vm517_vm5, %v412_v41, %v425_v42 }
 0x22a   : > { %v438_v44 = vpop.xlane.xlu1 %437 }
 0x22b   : > { %v520_v45 = vsel %vm519_vm6, %v518_v43, %v438_v44 }
 0x22c   : > { %v451_v46 = vpop.xlane.xlu0 %450 }
 0x22d   : > { %v522_v47 = vsel %vm521_vm7, %v520_v45, %v451_v46 }
 0x22e   : > { %v464_v48 = vpop.xlane.xlu1 %463 }
 0x22f   : > { %v524_v49 = vsel %vm523_vm8, %v522_v47, %v464_v48 }
 0x230   : > { %v477_v50 = vpop.xlane.xlu0 %476 }
 0x231   : > { %v526_v51 = vsel %vm525_vm9, %v524_v49, %v477_v50 }
 0x232   : > { %v490_v52 = vpop.xlane.xlu1 %489 }
 0x233   : > { %v528_v53 = vsel %vm527_vm10, %v526_v51, %v490_v52 }
 0x234   : > { %v503_v54 = vpop.xlane.xlu0 %502 }
 0x235   : > { %v530_v55 = vsel %vm529_vm11, %v528_v53, %v503_v54 }
 0x236   : > { %v516_v56 = vpop.xlane.xlu1 %515 }
 0x237   : > { %v531_v57 = vsel %vm312_vm4, %v530_v55, %v516_v56 }
 0x238   : > { %533 = vst.msk [vmem:[%s257_s13] sm:$0xff] %vm532_vm12, %v531_v57 }
 0x239 PF: > { %s16_s18 = sadd.s32 1, %s680_s18  }
 0x23a   : > { %p13_p5 = scmp.ge.s32.totalorder %s16_s18, 5  }
 0x23c   :  { %15 = sbr.rel (!%p13_p5) target bundleno = 1 (0x1), region = 81 }

// kernel: gated_residual_block.3
= control target key start
LH: loop header
LB: loop body
LE: loop exit
PB: predicated region body
PF: predicated region fallthrough
CT: control target
= control target key end

     0   :  { %s1621_s24 = smov 0   ;;  %s1769_s0 = inlined_call_operand.vmem [shape: f32[4,896], index: 0, kind: input, shape index: {}, may-alias: {0,1}]   ;;  %s1770_s1 = inlined_call_operand.vmem [shape: f32[4,896], index: 1, kind: input, shape index: {}, may-alias: {0,1}]   ;;  %s1771_s2 = inlined_call_operand.vmem [shape: f32[1,768], index: 2, kind: input, shape index: {}]   ;;  %s1772_s3 = inlined_call_operand.vmem [shape: f32[9,8,4], index: 3, kind: input, shape index: {}]   ;;  %s1773_s4 = inlined_call_operand.vmem [shape: f32[8,4], index: 4, kind: input, shape index: {}]   ;;  %s1774_s5 = inlined_call_operand.vmem [shape: f32[8,2], index: 5, kind: input, shape index: {}]   ;;  %s1775_s6 = inlined_call_operand.vmem [shape: bf16[8,768], index: 6, kind: output, shape index: {0}]   ;;  %s1776_s7 = inlined_call_operand.vmem [shape: f32[3,8,4], index: 7, kind: output, shape index: {1}]  }
   0x1 LB: > { %s1627_s25 = sadd.s32 4294967295, %s1568_s24   ;;  %p1466_p0 = scmp.ge.s32.totalorder %s1568_s24, 1  ;;  %s1568_s24 = sphi %s1621_s24, %s18_s24  }
   0x2   : > { %p276_p1 = scmp.lt.s32.totalorder %s1568_s24, 4 }
   0x4   : > { %p277_p2 = pnand %p1466_p0, %p276_p1 }
   0x5   : > { %s1632_s26 = sshll.u32 (!%p277_p2), %s1627_s25, 1  ;;  %s1570_s14 = smov (!%p277_p2), 109   ;;  %v1572_v3 = vmov (!%p277_p2), 0.0   ;;  %v1579_v12 = vmov (!%p277_p2), 0   ;;  %v1217_v13 = vld [vmem:[%s1774_s5] sm:$0xff] (!%p277_p2)  ;;  %v1580_v14 = vmov (!%p277_p2), 1  }
   0x6   : > { %280 = sbr.rel (%p277_p2) target bundleno = 560 (0x230), region = 44  ;;  %p331_p3 = scmp.lt.s32.totalorder (!%p277_p2), %s1632_s26, 6  ;;  %824 = vmatprep.mubr.f32.mxu0 (!%p277_p2), %v1572_v3  ;;  %458 = vmatprep.mubr.f32.mxu1 (!%p277_p2), %v1572_v3  ;;  %vm382_vm0 = vcmask (!%p277_p2), 1039360   ;;  %vm389_vm1 = vcmask (!%p277_p2), 1043456   ;;  %v1475_v23 = vld [vmem:[%s1772_s3 + $0x8] sm:$0xff] (!%p277_p2)  ;;  %vm750_vm2 = vcmask (!%p277_p2), 891904  }
   0x7   : > { %s1521_s27 = sadd.s32 (!%p277_p2), 2, %s1632_s26  ;;  %s1571_s15 = smov (!%p277_p2), 127   ;;  %1558 = vset.pattern.permute.xlu0 (!%p277_p2), %v1579_v12  ;;  %1559 = vset.pattern.permute.xlu1 (!%p277_p2), %v1580_v14  ;;  %vm385_vm3 = vcmask (!%p277_p2), 31744   ;;  %v1490_v28 = vld [vmem:[%s1772_s3 + $0x20] sm:$0xff] (!%p277_p2)  ;;  %vm846_vm4 = vcmask (!%p277_p2), 883712   ;;  %v1494_v36 = vld [vmem:[%s1772_s3 + $0x28] sm:$0xff] (!%p277_p2) }
   0x8   : > { %p342_p4 = scmp.lt.s32.totalorder (!%p277_p2), %s1521_s27, 6  ;;  %s1573_s16 = smov (!%p277_p2), 108   ;;  %v367_v32 = vld [vmem:[%s1772_s3] sm:$0xff] (!%p277_p2)  ;;  %vm942_vm5 = vcmask (!%p277_p2), 752640   ;;  %vm558_vm6 = vcmask (!%p277_p2), 1031168   ;;  %v1498_v44 = vld [vmem:[%s1772_s3 + $0x30] sm:$0xff] (!%p277_p2) }
   0x9   : > { %s1574_s17 = smov (!%p277_p2), 92   ;;  %s1575_s18 = smov (!%p277_p2), 126   ;;  %vm1038_vm7 = vcmask (!%p277_p2), 744448   ;;  %v1482_v51 = vld [vmem:[%s1772_s3 + $0x10] sm:$0xff] (!%p277_p2)  ;;  %v1502_v53 = vld [vmem:[%s1772_s3 + $0x38] sm:$0xff] (!%p277_p2)  ;;  %vm654_vm8 = vcmask (!%p277_p2), 900096  }
   0xa   : > { %s1576_s19 = smov (!%p277_p2), 91   ;;  %s1577_s20 = smov (!%p277_p2), 110   ;;  %vm1134_vm9 = vcmask (!%p277_p2), 736256   ;;  %v1506_v60 = vld [vmem:[%s1772_s3 + $0x40] sm:$0xff] (!%p277_p2)  ;;  %v1486_v62 = vld [vmem:[%s1772_s3 + $0x18] sm:$0xff] (!%p277_p2)  ;;  %vm1345_vm10 = vcmask (!%p277_p2), 7168  }
   0xb   : > { %s1578_s21 = smov (!%p277_p2), 90   ;;  %p349_p5 = scmp.lt.s32.totalorder (!%p277_p2), %s1632_s26, 5  ;;  %vm1347_vm11 = vcmask (!%p277_p2), 15360   ;;  %vm1349_vm12 = vcmask (!%p277_p2), 23552  }
   0xc   : > { %p359_p6 = scmp.lt.s32.totalorder (!%p277_p2), %s1627_s25, 2 }
   0xd   : > { %s332_s28 = scalar_select %p331_p3, %s1632_s26, 6 }
   0xe   : > { %s1778_s27 = smov (!%p342_p4, %s1521_s27), 6  ;;  %s1780_s26 = smov (!%p349_p5, %s1632_s26), 5 }
   0xf   : > { %s1468_s29 = sshll.u32 %s332_s28, 2  ;;  %s1470_s10 = sshll.u32 %s1778_s27, 2 }
  0x10   : > { %s334_s9 = scalar_lea.vmem %s1769_s0, %s1468_s29  ;;  %s345_s13 = scalar_lea.vmem %s1770_s1, %s1470_s10 }
  0x11   : > { %v1640_v0 = vld [vmem:[%s334_s9] sm:$0xff]  ;;  %s351_s29 = scalar_lea.vmem %s1771_s2, %s1780_s26  ;;  %s1473_s30 = sshll.u32 %s1780_s26, 2 }
  0x12   : > { %744 = vrot.lane.b32.xlu1 %v1640_v0, %s1570_s14  ;;  %v365_v1 = vld [vmem:[%s345_s13] sm:$0xf]  ;;  %v1648_v2 = vcombine.high %v1640_v0, %v1640_v0  ;;  %s357_s10 = scalar_lea.vmem %s1775_s6, %s1473_s30  ;;  %s1782_s25 = smov (!%p359_p6, %s1627_s25), 2 }
  0x13   : > { %366 = vst [vmem:[#allocation2 + $0x8] sm:$0xf] %v365_v1  ;;  %v1315_v1 = vlaneseq  ;;  %s1474_s26 = sshll.u32 %s1782_s25, 3 }
  0x14   : > { %s362_s13 = scalar_lea.vmem %s1776_s7, %s1474_s26 }
  0x16   : > { %376 = vrot.lane.b32.xlu1 %v1640_v0, %s1571_s15 }
  0x1a   : > { %v740_v4 = vld [vmem:[#allocation2 + $0x8] sm:$0xf]  ;;  %378 = vrot.lane.b32.xlu1 %v1648_v2, %s1571_s15 }
  0x1b   : > { %748 = vrot.lane.b32.xlu0 %v740_v4, %s1570_s14  ;;  %v372_v5 = vld [vmem:[#allocation2 + $0x8] sm:$0xf] }
  0x1c   : > { %v836_v6 = vld [vmem:[#allocation2 + $0x8] sm:$0xf] }
  0x1d   : > { %v548_v7 = vld [vmem:[#allocation2 + $0x8] sm:$0xf] }
  0x1e   : > { %842 = vrot.lane.b32.xlu1 %v1648_v2, %s1573_s16  ;;  %v1028_v8 = vld [vmem:[#allocation2 + $0x8] sm:$0xf] }
  0x1f   : > { %380 = vrot.lane.b32.xlu0 %v372_v5, %s1571_s15  ;;  %v932_v9 = vld [vmem:[#allocation2 + $0x8] sm:$0xf] }
  0x20   : > { %v644_v10 = vld [vmem:[#allocation2 + $0x8] sm:$0xf] }
  0x21   : > { %v1124_v11 = vld [vmem:[#allocation2 + $0x8] sm:$0xf] }
  0x22   : > { %938 = vrot.lane.b32.xlu1 %v1648_v2, %s1574_s17 }
  0x23   : > { %746 = vrot.lane.b32.xlu0 %v1648_v2, %s1570_s14 }
  0x26   : > { %936 = vrot.lane.b32.xlu1 %v1640_v0, %s1574_s17 }
  0x27   : > { %844 = vrot.lane.b32.xlu0 %v836_v6, %s1573_s16 }
  0x2a   : > { %556 = vrot.lane.b32.xlu1 %v548_v7, %s1575_s18  ;;  %v1313_v7 = vld [vmem:[%s351_s29] sm:$0x3] }
  0x2b   : > { %840 = vrot.lane.b32.xlu0 %v1640_v0, %s1573_s16 }
  0x2e   : > { %1036 = vrot.lane.b32.xlu1 %v1028_v8, %s1576_s19 }
  0x2f   : > { %940 = vrot.lane.b32.xlu0 %v932_v9, %s1574_s17 }
  0x32   : > { %1032 = vrot.lane.b32.xlu1 %v1640_v0, %s1576_s19 }
  0x33   : > { %554 = vrot.lane.b32.xlu0 %v1648_v2, %s1575_s18 }
  0x36   : > { %652 = vrot.lane.b32.xlu1 %v644_v10, %s1577_s20 }
  0x37   : > { %1034 = vrot.lane.b32.xlu0 %v1648_v2, %s1576_s19 }
  0x3a   : > { %1132 = vrot.lane.b32.xlu1 %v1124_v11, %s1578_s21 }
  0x3b   : > { %552 = vrot.lane.b32.xlu0 %v1640_v0, %s1575_s18 }
  0x3e   : > { %1128 = vrot.lane.b32.xlu1 %v1640_v0, %s1578_s21 }
  0x3f   : > { %650 = vrot.lane.b32.xlu0 %v1648_v2, %s1577_s20 }
  0x42   : > { %1227 = vperm.xlu1 %1559, %v1217_v13  }
  0x43   : > { %1130 = vrot.lane.b32.xlu0 %v1648_v2, %s1578_s21 }
  0x47   : > { %648 = vrot.lane.b32.xlu0 %v1640_v0, %s1577_s20 }
  0x4b   : > { %1220 = vperm.xlu0 %1558, %v1217_v13  }
  0x4f   : > { %1560 = vset.pattern.permute.xlu0 %v1580_v14 }
  0x84   : > { %v745_v15 = vpop.permute.xlu1 %744 }
  0x88   : > { %v377_v16 = vpop.permute.xlu1 %376 }
  0x8c   : > { %v379_v17 = vpop.permute.xlu1 %378 }
  0x8d   : > { %v749_v18 = vpop.permute.xlu0 %748  ;;  %v383_v21 = vsel %vm382_vm0, %v377_v16, %v379_v17 }
  0x90   : > { %v843_v19 = vpop.permute.xlu1 %842 }
  0x91   : > { %v381_v20 = vpop.permute.xlu0 %380 }
  0x92   : > { %v384_v22 = vsel %vm382_vm0, %v379_v17, %v381_v20 }
  0x93   : > { %1476 = vmatprep.subr.msk.mxu1 %vm389_vm1, %v384_v22 }
  0x94   : > { %1477 = vmatpush1.msk.msra.mxu1 %vm389_vm1, %v383_v21  ;;  %v939_v24 = vpop.permute.xlu1 %938 }
  0x95   : > { %v747_v25 = vpop.permute.xlu0 %746  ;;  %1478 = vmatmul.mubr.msk.f32.vlgmr.msra.gmra.mrb[0].mxu1 %vm385_vm3, %v1475_v23  ;;  %1479 = vmatprep.subr.msk.mxu1 %vm389_vm1, %v1648_v2  ;;  %v1316_v2 = vshrl.u32 %v1315_v1, 7 }
  0x96   : > { %v1678_v26 = vsel %vm750_vm2, %v747_v25, %v749_v18  ;;  %v1680_v27 = vsel %vm750_vm2, %v745_v15, %v747_v25  ;;  %1480 = vmatpush1.msk.msra.mxu1 %vm389_vm1, %v1640_v0  ;;  %538 = vmatprep.mubr.f32.mxu1 %v1572_v3  ;;  %v1225_v0 = vld [vmem:[%s1773_s4] sm:$0xff] }
  0x97   : > { %1491 = vmatprep.subr.msk.mxu0 %vm389_vm1, %v1678_v26  ;;  %v1317_v5 = vsub.s32 0, %v1316_v2  ;;  %v1321_v8 = vsub.s32 1, %v1316_v2 }
  0x98   : > { %1492 = vmatpush1.msk.msra.mxu0 %vm389_vm1, %v1680_v27  ;;  %v937_v29 = vpop.permute.xlu1 %936 }
  0x99   : > { %v845_v30 = vpop.permute.xlu0 %844  ;;  %1493 = vmatmul.mubr.msk.f32.vlgmr.msra.gmra.mrb[0].mxu0 %vm385_vm3, %v1490_v28  ;;  %v943_v40 = vsel %vm942_vm5, %v937_v29, %v939_v24  ;;  %v1318_v12 = vrot.slane %v1313_v7, %v1317_v5  ;;  %v1322_v15 = vrot.slane %v1313_v7, %v1321_v8 }
  0x9a   : > { %v848_v31 = vsel %vm846_vm4, %v843_v19, %v845_v30  ;;  %920 = vmatprep.mubr.f32.mxu0 %v1572_v3 }
  0x9b   : > { %1495 = vmatprep.subr.msk.mxu0 %vm389_vm1, %v848_v31 }
  0x9c   : > { %v557_v33 = vpop.permute.xlu1 %556 }
  0x9d   : > { %v841_v34 = vpop.permute.xlu0 %840  ;;  %1481 = vmatmul.mubr.msk.f32.vlgmr.msra.gmra.mrb[0].mxu1 %vm385_vm3, %v367_v32 }
  0x9e   : > { %v847_v35 = vsel %vm846_vm4, %v841_v34, %v843_v19  ;;  %632 = vmatprep.mubr.f32.mxu1 %v1572_v3 }
  0x9f   : > { %1496 = vmatpush1.msk.msra.mxu0 %vm389_vm1, %v847_v35 }
  0xa0   : > { %v1037_v37 = vpop.permute.xlu1 %1036 }
  0xa1   : > { %v941_v38 = vpop.permute.xlu0 %940  ;;  %1497 = vmatmul.mubr.msk.f32.vlgmr.msra.gmra.mrb[0].mxu0 %vm385_vm3, %v1494_v36 }
  0xa2   : > { %v944_v39 = vsel %vm942_vm5, %v939_v24, %v941_v38  ;;  %1016 = vmatprep.mubr.f32.mxu0 %v1572_v3 }
  0xa3   : > { %1499 = vmatprep.subr.msk.mxu0 %vm389_vm1, %v944_v39 }
  0xa4   : > { %1500 = vmatpush1.msk.msra.mxu0 %vm389_vm1, %v943_v40  ;;  %v1033_v41 = vpop.permute.xlu1 %1032 }
  0xa5   : > { %v555_v42 = vpop.permute.xlu0 %554 }
  0xa6   : > { %v560_v43 = vsel %vm558_vm6, %v555_v42, %v557_v33 }
  0xa7   : > { %1483 = vmatprep.subr.msk.mxu1 %vm389_vm1, %v560_v43 }
  0xa8   : > { %v653_v45 = vpop.permute.xlu1 %652 }
  0xa9   : > { %v1035_v46 = vpop.permute.xlu0 %1034  ;;  %1501 = vmatmul.mubr.msk.f32.vlgmr.msra.gmra.mrb[0].mxu0 %vm385_vm3, %v1498_v44 }
  0xaa   : > { %v1040_v47 = vsel %vm1038_vm7, %v1035_v46, %v1037_v37  ;;  %v1039_v48 = vsel %vm1038_vm7, %v1033_v41, %v1035_v46  ;;  %1112 = vmatprep.mubr.f32.mxu0 %v1572_v3 }
  0xab   : > { %1503 = vmatprep.subr.msk.mxu0 %vm389_vm1, %v1040_v47 }
  0xac   : > { %1504 = vmatpush1.msk.msra.mxu0 %vm389_vm1, %v1039_v48  ;;  %v1133_v50 = vpop.permute.xlu1 %1132 }
  0xad   : > { %v553_v49 = vpop.permute.xlu0 %552 }
  0xae   : > { %v559_v52 = vsel %vm558_vm6, %v553_v49, %v555_v42 }
  0xaf   : > { %1484 = vmatpush1.msk.msra.mxu1 %vm389_vm1, %v559_v52 }
  0xb0   : > { %1485 = vmatmul.mubr.msk.f32.vlgmr.msra.gmra.mrb[0].mxu1 %vm385_vm3, %v1482_v51  ;;  %v1129_v56 = vpop.permute.xlu1 %1128 }
  0xb1   : > { %v651_v54 = vpop.permute.xlu0 %650  ;;  %1505 = vmatmul.mubr.msk.f32.vlgmr.msra.gmra.mrb[0].mxu0 %vm385_vm3, %v1502_v53  ;;  %728 = vmatprep.mubr.f32.mxu1 %v1572_v3 }
  0xb2   : > { %v656_v55 = vsel %vm654_vm8, %v651_v54, %v653_v45  ;;  %1208 = vmatprep.mubr.f32.mxu0 %v1572_v3 }
  0xb3   : > { %1487 = vmatprep.subr.msk.mxu1 %vm389_vm1, %v656_v55 }
  0xb5   : > { %v1131_v57 = vpop.permute.xlu0 %1130 }
  0xb6   : > { %v1136_v58 = vsel %vm1134_vm9, %v1131_v57, %v1133_v50  ;;  %v1135_v59 = vsel %vm1134_vm9, %v1129_v56, %v1131_v57 }
  0xb7   : > { %1507 = vmatprep.subr.msk.mxu0 %vm389_vm1, %v1136_v58 }
  0xb8   : > { %1508 = vmatpush1.msk.msra.mxu0 %vm389_vm1, %v1135_v59 }
  0xb9   : > { %v649_v61 = vpop.permute.xlu0 %648  ;;  %1509 = vmatmul.mubr.msk.f32.vlgmr.msra.gmra.mrb[0].mxu0 %vm385_vm3, %v1506_v60 }
  0xba   : > { %v655_v63 = vsel %vm654_vm8, %v649_v61, %v651_v54 }
  0xbb   : > { %1488 = vmatpush1.msk.msra.mxu1 %vm389_vm1, %v655_v63 }
  0xbc   : > { %1489 = vmatmul.mubr.msk.f32.vlgmr.msra.gmra.mrb[0].mxu1 %vm385_vm3, %v1486_v62  ;;  %1510 = vmatprep.subr.msk.mxu1 %vm389_vm1, %v1678_v26 }
  0xbd   : > { %1511 = vmatpush1.msk.msra.mxu1 %vm389_vm1, %v1680_v27  ;;  %1297 = vmatprep.mubr.f32.mxu1 %v1572_v3 }
  0xc0   : > { %1512 = vmatmul.mubr.msk.f32.vlgmr.msra.gmra.mrb[2].mxu1 %vm385_vm3, %v1225_v0 }
  0xc1   : > { %v1228_v14 = vpop.permute.xlu1 %1227 }
  0xca   : > { %v1221_v9 = vpop.permute.xlu0 %1220 }
 0x18c   : > { %v1210_v4 = vpop.f32.mrb[0].mxu0 }
 0x18d   : > { %v1212_v6 = vpop.f32.mrb[1].mxu0 }
 0x18f   : > { %v730_v3 = vpop.f32.mrb[0].mxu1 }
 0x190   : > { %v1523_v10 = vadd.f32 %v1210_v4, %v730_v3  ;;  %v732_v11 = vpop.f32.mrb[1].mxu1 }
 0x191   : > { %v1524_v13 = vadd.f32 %v1212_v6, %v732_v11 }
 0x192   : > { %v1223_v16 = vadd.f32 %v1523_v10, %v1221_v9 }
 0x193   : > { %v1224_v17 = vadd.f32 %v1524_v13, %v1221_v9  ;;  %v1299_v18 = vpop.f32.mrb[2].mxu1 }
 0x194   : > { %v1300_v19 = vadd.f32 %v1299_v18, %v1228_v14  ;;  %v1301_v20 = vpop.f32.mrb[3].mxu1  ;;  %v1325_v21 = vmul.f32 %v1318_v12, %v1223_v16 }
 0x195   : > { %v1522_v22 = vpack.c.bf16 %v1224_v17, %v1223_v16  ;;  %v1302_v23 = vadd.f32 %v1301_v20, %v1228_v14  ;;  %v1326_v24 = vmul.f32 %v1322_v15, %v1224_v17 }
 0x196   : > { %v1332_v25 = vmul.f32 %v1325_v21, %v1223_v16  ;;  %v1327_v26 = vmul.f32 %v1318_v12, %v1300_v19 }
 0x197   : > { %1312 = vst [vmem:[%s357_s10] sm:$0xff] %v1522_v22  ;;  %v1328_v27 = vmul.f32 %v1322_v15, %v1302_v23  ;;  %v1329_v28 = vadd.f32 %v1326_v24, %v1325_v21  ;;  %v1333_v29 = vmul.f32 %v1326_v24, %v1224_v17 }
 0x198   : > { %v1340_v30 = vmul.f32 %v1327_v26, %v1300_v19 }
 0x199   : > { %v1341_v31 = vmul.f32 %v1328_v27, %v1302_v23  ;;  %1330 = vadd.xlane.f32.xlu1 %v1329_v28  ;;  %v1334_v32 = vadd.f32 %v1333_v29, %v1332_v25  ;;  %v1337_v33 = vadd.f32 %v1328_v27, %v1327_v26 }
 0x19b   : > { %1335 = vadd.xlane.f32.xlu0 %v1334_v32  ;;  %v1342_v34 = vadd.f32 %v1341_v31, %v1340_v30 }
 0x19d   : > { %1343 = vadd.xlane.f32.xlu1 %v1342_v34 }
 0x19f   : > { %1338 = vadd.xlane.f32.xlu0 %v1337_v33 }
 0x226   : > { %v1331_v35 = vpop.xlane.xlu1 %1330 }
 0x228   : > { %v1336_v36 = vpop.xlane.xlu0 %1335 }
 0x229   : > { %v1346_v37 = vsel %vm1345_vm10, %v1331_v35, %v1336_v36 }
 0x22a   : > { %v1344_v40 = vpop.xlane.xlu1 %1343 }
 0x22c   : > { %v1339_v38 = vpop.xlane.xlu0 %1338 }
 0x22d   : > { %v1348_v39 = vsel %vm1347_vm11, %v1346_v37, %v1339_v38 }
 0x22e   : > { %v1350_v41 = vsel %vm1349_vm12, %v1348_v39, %v1344_v40 }
 0x22f   : > { %1351 = vst.msk [vmem:[%s362_s13] sm:$0xff] %vm385_vm3, %v1350_v41 }
 0x230 PF: > { %s18_s24 = sadd.s32 1, %s1568_s24  }
 0x231   : > { %p15_p7 = scmp.ge.s32.totalorder %s18_s24, 5  }
 0x233   :  { %17 = sbr.rel (!%p15_p7) target bundleno = 1 (0x1), region = 100 }

// kernel: gated_residual_block.5
= control target key start
LH: loop header
LB: loop body
LE: loop exit
PB: predicated region body
PF: predicated region fallthrough
CT: control target
= control target key end

     0   :  { %s795_s21 = smov 0   ;;  %s840_s0 = inlined_call_operand.vmem [shape: bf16[8,768], index: 0, kind: input, shape index: {}]   ;;  %s841_s1 = inlined_call_operand.vmem [shape: f32[4,896], index: 1, kind: input, shape index: {}, may-alias: {1,2}]   ;;  %s842_s2 = inlined_call_operand.vmem [shape: f32[4,896], index: 2, kind: input, shape index: {}, may-alias: {1,2}]   ;;  %s843_s3 = inlined_call_operand.vmem [shape: f32[8,8], index: 3, kind: input, shape index: {}]   ;;  %s844_s4 = inlined_call_operand.vmem [shape: f32[8,4], index: 4, kind: input, shape index: {}]   ;;  %s845_s5 = inlined_call_operand.vmem [shape: f32[8,6], index: 5, kind: input, shape index: {}]   ;;  %s846_s6 = inlined_call_operand.vmem [shape: f32[8,768], index: 6, kind: output, shape index: {}]  }
   0x1 LB: > { %s674_s22 = sadd.s32 4294967295, %s750_s21   ;;  %p680_p0 = scmp.ge.s32.totalorder %s750_s21, 1  ;;  %s750_s21 = sphi %s795_s21, %s16_s21  }
   0x2   : > { %p249_p1 = scmp.lt.s32.totalorder %s750_s21, 4 }
   0x4   : > { %p250_p2 = pnand %p680_p0, %p249_p1 }
   0x5   : > { %v329_v0 = vld [vmem:[%s845_s5] sm:$0xff] (!%p250_p2)  ;;  %s806_s25 = sshll.u32 (!%p250_p2), %s674_s22, 1  ;;  %v752_v1 = vmov (!%p250_p2), 0   ;;  %v753_v2 = vmov (!%p250_p2), 1   ;;  %v754_v5 = vmov (!%p250_p2), 0.0   ;;  %v755_v6 = vmov (!%p250_p2), 2  }
   0x6   : > { %253 = sbr.rel (%p250_p2) target bundleno = 439 (0x1b7), region = 44  ;;  %717 = vset.pattern.permute.xlu0 (!%p250_p2), %v752_v1  ;;  %s700_s26 = sadd.s32 (!%p250_p2), 2, %s806_s25  ;;  %414 = vmatprep.mubr.f32.mxu0 (!%p250_p2), %v754_v5  ;;  %v756_v7 = vmov (!%p250_p2), 3   ;;  %v758_v10 = vmov (!%p250_p2), 5   ;;  %v759_v11 = vmov (!%p250_p2), 4   ;;  %vm459_vm0 = vcmask (!%p250_p2), 891904  }
   0x7   : > { %p305_p3 = scmp.lt.s32.totalorder (!%p250_p2), %s806_s25, 6  ;;  %334 = vperm.xlu0 (!%p250_p2), %717, %v329_v0   ;;  %p316_p4 = scmp.lt.s32.totalorder (!%p250_p2), %s700_s26, 6  ;;  %535 = vmatprep.mubr.f32.mxu1 (!%p250_p2), %v754_v5  ;;  %vm466_vm1 = vcmask (!%p250_p2), 1043456   ;;  %v345_v23 = vld [vmem:[%s843_s3] sm:$0xff] (!%p250_p2)  ;;  %vm346_vm2 = vcmask (!%p250_p2), 64512   ;;  %vm462_vm3 = vcmask (!%p250_p2), 31744  }
   0x8   : > { %720 = vset.pattern.permute.xlu1 (!%p250_p2), %v756_v7  ;;  %s757_s12 = smov (!%p250_p2), 109   ;;  %p295_p5 = scmp.lt.s32.totalorder (!%p250_p2), %s806_s25, 5  ;;  %v447_v26 = vld [vmem:[%s844_s4] sm:$0xff] (!%p250_p2) }
   0xb   : > { %718 = vset.pattern.permute.xlu0 (!%p250_p2), %v753_v2 }
   0xc   : > { %340 = vperm.xlu0 (!%p250_p2), %718, %v329_v0  }
   0xd   : > { %s306_s27 = scalar_select %p305_p3, %s806_s25, 6 }
   0xe   : > { %s848_s26 = smov (!%p316_p4, %s700_s26), 6  ;;  %s850_s25 = smov (!%p295_p5, %s806_s25), 5 }
   0xf   : > { %s684_s28 = sshll.u32 %s306_s27, 2  ;;  %s686_s29 = sshll.u32 %s848_s26, 2 }
  0x10   : > { %s308_s8 = scalar_lea.vmem %s841_s1, %s684_s28  ;;  %s319_s11 = scalar_lea.vmem %s842_s2, %s686_s29  ;;  %719 = vset.pattern.permute.xlu0 %v755_v6 }
  0x11   : > { %v443_v3 = vld [vmem:[%s308_s8] sm:$0xff]  ;;  %422 = vperm.xlu0 %719, %v329_v0   ;;  %s682_s13 = sshll.u32 %s850_s25, 2  ;;  %s688_s22 = sshll.u32 %s850_s25, 3 }
  0x12   : > { %v445_v4 = vld [vmem:[%s319_s11] sm:$0xf]  ;;  %v452_v9 = vcombine.high %v443_v3, %v443_v3  ;;  %s298_s16 = scalar_lea.vmem %s840_s0, %s682_s13  ;;  %s326_s26 = scalar_lea.vmem %s846_s6, %s688_s22 }
  0x13   : > { %446 = vst [vmem:[#allocation2 + $0x8] sm:$0xf] %v445_v4  ;;  %v328_v12 = vld [vmem:[%s298_s16] sm:$0xff] }
  0x14   : > { %v330_v14 = vunpack.c.l.bf16 %v328_v12  ;;  %v331_v15 = vunpack.c.h.bf16 %v328_v12 }
  0x15   : > { %722 = vset.pattern.permute.xlu0 %v758_v10 }
  0x16   : > { %551 = vperm.xlu0 %722, %v329_v0  }
  0x1a   : > { %v449_v8 = vld [vmem:[#allocation2 + $0x8] sm:$0xf] }
  0x1b   : > { %457 = vrot.lane.b32.xlu1 %v449_v8, %s757_s12 }
  0x1f   : > { %455 = vrot.lane.b32.xlu1 %v452_v9, %s757_s12 }
  0x23   : > { %453 = vrot.lane.b32.xlu1 %v443_v3, %s757_s12 }
  0x27   : > { %428 = vperm.xlu1 %720, %v329_v0  }
  0x2b   : > { %721 = vset.pattern.permute.xlu1 %v759_v11 }
  0x2c   : > { %545 = vperm.xlu1 %721, %v329_v0  }
  0x86   : > { %v335_v13 = vpop.permute.xlu0 %334 }
  0x87   : > { %v337_v17 = vmul.f32 %v335_v13, %v330_v14  ;;  %v338_v18 = vmul.f32 %v335_v13, %v331_v15 }
  0x8b   : > { %v341_v19 = vpop.permute.xlu0 %340 }
  0x8c   : > { %v344_v20 = vadd.f32 %v341_v19, %v338_v18  ;;  %v343_v21 = vadd.f32 %v341_v19, %v337_v17 }
  0x8d   : > { %v458_v16 = vpop.permute.xlu1 %457 }
  0x8e   : > { %350 = vmatprep.subr.mxu0 %v344_v20 }
  0x8f   : > { %351 = vmatpush1.msra.mxu0 %v343_v21 }
  0x90   : > { %689 = vmatmul.mubr.msk.f32.vlgmr.msra.gmra.mrb[0].mxu0 %vm346_vm2, %v345_v23  ;;  %v423_v28 = vpop.permute.xlu0 %422 }
  0x91   : > { %v456_v22 = vpop.permute.xlu1 %455 }
  0x92   : > { %v461_v24 = vsel %vm459_vm0, %v456_v22, %v458_v16 }
  0x93   : > { %690 = vmatprep.subr.msk.mxu1 %vm466_vm1, %v461_v24 }
  0x95   : > { %v454_v25 = vpop.permute.xlu1 %453  ;;  %v552_v49 = vpop.permute.xlu0 %551 }
  0x96   : > { %v460_v27 = vsel %vm459_vm0, %v454_v25, %v456_v22 }
  0x97   : > { %691 = vmatpush1.msk.msra.mxu1 %vm466_vm1, %v460_v27 }
  0x98   : > { %692 = vmatmul.mubr.msk.f32.vlgmr.msra.gmra.mrb[0].mxu1 %vm462_vm3, %v447_v26 }
  0xa6   : > { %v429_v30 = vpop.permute.xlu1 %428 }
  0xab   : > { %v546_v46 = vpop.permute.xlu1 %545 }
 0x163   : > { %v416_v29 = vpop.f32.mrb[0].mxu0 }
 0x164   : > { %v425_v31 = vmul.f32 %v423_v28, %v416_v29  ;;  %v418_v32 = vpop.f32.mrb[1].mxu0 }
 0x165   : > { %v426_v33 = vmul.f32 %v423_v28, %v418_v32 }
 0x166   : > { %v431_v34 = vadd.f32 %v429_v30, %v425_v31 }
 0x167   : > { %v432_v36 = vadd.f32 %v429_v30, %v426_v33 }
 0x168   : > { %v433_v38 = vsub.f32 0.0, %v431_v34 }
 0x169   : > { %v434_v39 = vsub.f32 0.0, %v432_v36 }
 0x16a   : > { %v435_v40 = vmul.f32 1.442695, %v433_v38 }
 0x16b   : > { %v537_v35 = vpop.f32.mrb[0].mxu1  ;;  %v437_v41 = vmul.f32 1.442695, %v434_v39 }
 0x16c   : > { %v539_v37 = vpop.f32.mrb[1].mxu1  ;;  %724 = vpow2.f32 %v435_v40  ;;  %v548_v47 = vmul.f32 %v546_v46, %v537_v35 }
 0x16d   : > { %726 = vpow2.f32 %v437_v41  ;;  %v549_v48 = vmul.f32 %v546_v46, %v539_v37 }
 0x16e   : > { %v554_v50 = vadd.f32 %v552_v49, %v548_v47 }
 0x16f   : > { %v555_v52 = vadd.f32 %v552_v49, %v549_v48 }
 0x176   : > { %v725_v42 = vpop.eup %724 }
 0x177   : > { %v727_v43 = vpop.eup %726  ;;  %v439_v44 = vadd.f32 1.0, %v725_v42 }
 0x178   : > { %v440_v45 = vadd.f32 1.0, %v727_v43 }
 0x179   : > { %728 = vrcp.f32 %v439_v44 }
 0x17a   : > { %730 = vrcp.f32 %v440_v45 }
 0x183   : > { %v729_v51 = vpop.eup %728 }
 0x184   : > { %v731_v53 = vpop.eup %730  ;;  %v556_v54 = vmul.f32 %v729_v51, %v343_v21 }
 0x185   : > { %v557_v55 = vmul.f32 %v731_v53, %v344_v20 }
 0x186   : > { %v558_v56 = vadd.f32 %v556_v54, %v554_v50 }
 0x187   : > { %v559_v57 = vadd.f32 %v557_v55, %v555_v52 }
 0x188   : > { %v562_v58 = vmin.f32 %v558_v56, 20.0  ;;  %vm560_vm5 = vcmp.gt.f32.partialorder %v558_v56, 20.0 }
 0x189   : > { %v563_v59 = vmin.f32 %v559_v57, 20.0  ;;  %vm561_vm7 = vcmp.gt.f32.partialorder %v559_v57, 20.0 }
 0x18a   : > { %v564_v60 = vmul.f32 1.442695, %v562_v58 }
 0x18b   : > { %v566_v61 = vmul.f32 1.442695, %v563_v59 }
 0x18c   : > { %732 = vpow2.f32 %v564_v60 }
 0x18d   : > { %734 = vpow2.f32 %v566_v61 }
 0x196   : > { %v733_v62 = vpop.eup %732 }
 0x197   : > { %v735_v63 = vpop.eup %734  ;;  %v568_v0 = vadd.f32 1.0, %v733_v62  ;;  %v571_v2 = vmul.f32 -0.5, %v733_v62  ;;  %v574_v5 = vand.u32 2147483647, %v733_v62 }
 0x198   : > { %v577_v1 = vadd.f32 1.0, %v735_v63  ;;  %v580_v3 = vmul.f32 -0.5, %v735_v63  ;;  %v583_v7 = vand.u32 2147483647, %v735_v63 }
 0x199   : > { %736 = vlog2.f32 %v568_v0  ;;  %v572_v4 = vadd.f32 1.0, %v571_v2  ;;  %vm575_vm4 = vcmp.lt.f32.partialorder %v574_v5, 0.0004427343 }
 0x19a   : > { %738 = vlog2.f32 %v577_v1  ;;  %v581_v6 = vadd.f32 1.0, %v580_v3  ;;  %vm584_vm6 = vcmp.lt.f32.partialorder %v583_v7, 0.0004427343 }
 0x19b   : > { %v573_v11 = vmul.f32 %v733_v62, %v572_v4 }
 0x19c   : > { %v582_v13 = vmul.f32 %v735_v63, %v581_v6 }
 0x1a3   : > { %v737_v8 = vpop.eup %736 }
 0x1a4   : > { %v739_v9 = vpop.eup %738  ;;  %v570_v10 = vmul.f32 0.6931472, %v737_v8 }
 0x1a5   : > { %v579_v12 = vmul.f32 0.6931472, %v739_v9 }
 0x1a6   : > { %v576_v14 = vsel %vm575_vm4, %v573_v11, %v570_v10 }
 0x1a7   : > { %v585_v15 = vsel %vm584_vm6, %v582_v13, %v579_v12  ;;  %v586_v16 = vsel %vm560_vm5, %v558_v56, %v576_v14 }
 0x1a8   : > { %v587_v17 = vsel %vm561_vm7, %v559_v57, %v585_v15  ;;  %740 = vtanh.f32 %v586_v16 }
 0x1a9   : > { %742 = vtanh.f32 %v587_v17 }
 0x1b2   : > { %v741_v18 = vpop.eup %740 }
 0x1b3   : > { %v743_v19 = vpop.eup %742  ;;  %v590_v20 = vmul.f32 %v741_v18, %v558_v56 }
 0x1b4   : > { %v591_v21 = vmul.f32 %v743_v19, %v559_v57 }
 0x1b5   : > { %592 = vst [vmem:[%s326_s26] sm:$0xff] %v590_v20 }
 0x1b6   : > { %593 = vst [vmem:[%s326_s26 + $0x8] sm:$0xff] %v591_v21 }
 0x1b7 PF: > { %s16_s21 = sadd.s32 1, %s750_s21  }
 0x1b8   : > { %p13_p6 = scmp.ge.s32.totalorder %s16_s21, 5  }
 0x1ba   :  { %15 = sbr.rel (!%p13_p6) target bundleno = 1 (0x1), region = 80 }

</bundles_post_ra>
